<compile_context>
chip_gen: v6e
topology: v6e:2x2x1
jax: 0.10.0
libtpu: 0.0.40
codegen_flags: <defaults>
</compile_context>

<pallas_src>
import functools

import jax
import jax.numpy as jnp
from jax import lax
from jax.experimental import pallas as pl
from jax.experimental.pallas import tpu as pltpu

_VMEM_LIMIT = 48 * 1024 * 1024  # above v5e/v6e/v7x scoped defaults, below v7x physical


def _round_up(x, m):
    return (x + m - 1) // m * m


def _heads_per_block(n_head, d_head, max_lanes=512):
    """Heads per grid step.  The head axis is the second-to-last dim of the
    q/k/v/r blocks, so a partial head block must be a multiple of 8 (sublane
    tiling) or all heads.  Prefer >=128 output lanes per head block."""
    valid = [c for c in range(1, n_head + 1)
             if n_head % c == 0 and (c == n_head or c % 8 == 0)]
    for c in valid:
        if 128 <= c * d_head <= max_lanes:
            return c
    fits = [c for c in valid if c * d_head <= max_lanes]
    return max(fits) if fits else min(valid)


# --------------------------------------------------------------------------
# Kernel A: plain linear (qkv_net, r_net), row-tiled grid, resident weights.
# --------------------------------------------------------------------------
def _linear_kernel(x_ref, w_ref, b_ref, o_ref):
    acc = jnp.dot(x_ref[...], w_ref[...], preferred_element_type=jnp.float32)
    o_ref[...] = (acc + b_ref[...].astype(jnp.float32)).astype(o_ref.dtype)


def _linear(x, w, b, *, block_rows=512):
    n, d_in = x.shape
    d_out = w.shape[1]
    bm = min(block_rows, _round_up(n, 8))
    n_pad = _round_up(n, bm)
    if n_pad != n:
        x = jnp.pad(x, ((0, n_pad - n), (0, 0)))
    out = pl.pallas_call(
        _linear_kernel,
        out_shape=jax.ShapeDtypeStruct((n_pad, d_out), x.dtype),
        grid=(n_pad // bm,),
        in_specs=[pl.BlockSpec((bm, d_in), lambda i: (i, 0)),
                  pl.BlockSpec((d_in, d_out), lambda i: (0, 0)),   # resident weight
                  pl.BlockSpec((1, d_out), lambda i: (0, 0))],     # resident bias
        out_specs=pl.BlockSpec((bm, d_out), lambda i: (i, 0)),
        compiler_params=pltpu.CompilerParams(
            dimension_semantics=("parallel",),
            vmem_limit_bytes=_VMEM_LIMIT),
    )(x, w, b.reshape(1, d_out))
    return out[:n] if n_pad != n else out


# --------------------------------------------------------------------------
# Kernel B: fused rel-attention + o_net + residual + LayerNorm.
# grid = (bsz, n_head // hb); output accumulated across head blocks.
# --------------------------------------------------------------------------
def _rel_attn_out_ln_kernel(*refs, scale, eps, qlen, klen, hb, pad_width,
                            causal, mlen):
    if causal:
        (wh_ref, r_ref, rwb_ref, rrb_ref, wo_ref, bo_ref, res_ref,
         gam_ref, bet_ref, o_ref, acc_ref) = refs
        mask_ref = None
    else:
        (wh_ref, r_ref, rwb_ref, rrb_ref, mask_ref, wo_ref, bo_ref, res_ref,
         gam_ref, bet_ref, o_ref, acc_ref) = refs

    g = pl.program_id(1)
    d_model = o_ref.shape[-1]

    @pl.when(g == 0)
    def _init():
        acc_ref[...] = jnp.zeros_like(acc_ref)

    if causal:
        row = lax.broadcasted_iota(jnp.int32, (qlen, klen), 0)
        col = lax.broadcasted_iota(jnp.int32, (qlen, klen), 1)
        masked = col > row + mlen
    else:
        masked = mask_ref[...] != 0

    zero_pad = (jnp.zeros((qlen, pad_width - klen), jnp.float32)
                if pad_width > klen else None)
    dims = (((1,), (1,)), ((), ()))  # contract d_head:  A @ B^T
    contrib = jnp.zeros((qlen, d_model), jnp.float32)

    for h in range(hb):  # static unroll over the head block
        q = wh_ref[:, 0, h, :]                       # (qlen, d_head)
        k = wh_ref[:, 1, h, :]                       # (klen, d_head)
        v = wh_ref[:, 2, h, :]                       # (klen, d_head)
        r = r_ref[:, h, :]                           # (rlen, d_head)
        rw_q = q + rwb_ref[h:h + 1, :].astype(q.dtype)
        rr_q = q + rrb_ref[h:h + 1, :].astype(q.dtype)

        ac = lax.dot_general(rw_q, k, dims, preferred_element_type=jnp.float32)
        bd_raw = lax.dot_general(rr_q, r, dims, preferred_element_type=jnp.float32)

        # Transformer-XL rel-shift: bd[i, j] = bd_raw[i, j + qlen - 1 - i].
        # Statically pre-rotate each padded row by (qlen-1), then a single
        # strided XLU rotate (row i rotated right by i) finishes the shift.
        # Out-of-range positions become 0 and are masked to -inf by the
        # (required) causal attn_mask, matching the PyTorch forward output.
        if qlen > 1:
            pieces = [bd_raw[:, qlen - 1:]]
            if zero_pad is not None:
                pieces.append(zero_pad)
            pieces.append(bd_raw[:, :qlen - 1])
            padded = jnp.concatenate(pieces, axis=-1)        # (qlen, pad_width)
            shifted = pltpu.roll(padded, 0, 1, stride=1, stride_axis=0)
            bd = shifted[:, :klen]
        else:
            bd = bd_raw

        score = (ac + bd) * scale
        score = jnp.where(masked, -jnp.inf, score)
        m = jnp.max(score, axis=-1, keepdims=True)
        e = jnp.exp(score - m)
        p = e * pl.reciprocal(jnp.sum(e, axis=-1, keepdims=True), approx=True)

        attn_h = jnp.dot(p.astype(v.dtype), v, preferred_element_type=jnp.float32)
        contrib = contrib + jnp.dot(attn_h.astype(wo_ref.dtype), wo_ref[h],
                                    preferred_element_type=jnp.float32)

    acc_ref[...] += contrib

    @pl.when(g == pl.num_programs(1) - 1)
    def _finalize():
        s = (acc_ref[...] + bo_ref[...].astype(jnp.float32)
             + res_ref[...].astype(jnp.float32))          # dropout = eval identity
        mu = jnp.mean(s, axis=-1, keepdims=True)
        var = jnp.mean(jnp.square(s - mu), axis=-1, keepdims=True)
        y = (s - mu) * lax.rsqrt(var + eps)
        o_ref[...] = (y * gam_ref[...].astype(jnp.float32)
                      + bet_ref[...].astype(jnp.float32)).astype(o_ref.dtype)


def _fused_rel_attention(wh5, rk3, r_w_bias, r_r_bias, mask, w_o3, b_o, res_bq,
                         ln_g, ln_b, *, scale, eps, hb, out_dtype):
    bsz, qlen, _, n_head, d_head = wh5.shape
    rlen = rk3.shape[0]
    klen = qlen                       # this module has no memory: klen == qlen == rlen
    d_model = res_bq.shape[-1]
    grp = n_head // hb
    pad_width = _round_up(max(klen + qlen - 1, klen), 128)

    kernel = functools.partial(
        _rel_attn_out_ln_kernel, scale=scale, eps=eps, qlen=qlen, klen=klen,
        hb=hb, pad_width=pad_width, causal=mask is None, mlen=klen - qlen)

    in_specs = [
        pl.BlockSpec((None, qlen, 3, hb, d_head), lambda b, g: (b, 0, 0, g, 0)),  # qkv heads
        pl.BlockSpec((rlen, hb, d_head), lambda b, g: (0, g, 0)),                 # r heads
        pl.BlockSpec((hb, d_head), lambda b, g: (g, 0)),                          # r_w_bias
        pl.BlockSpec((hb, d_head), lambda b, g: (g, 0)),                          # r_r_bias
    ]
    args = [wh5, rk3, r_w_bias, r_r_bias]
    if mask is not None:
        if mask.ndim == 2:
            in_specs.append(pl.BlockSpec((qlen, klen), lambda b, g: (0, 0)))
        else:
            in_specs.append(pl.BlockSpec((None, qlen, klen), lambda b, g: (b, 0, 0)))
        args.append(mask)
    in_specs += [
        pl.BlockSpec((hb, d_head, d_model), lambda b, g: (g, 0, 0)),              # w_o per head
        pl.BlockSpec((1, d_model), lambda b, g: (0, 0)),                          # b_o
        pl.BlockSpec((None, qlen, d_model), lambda b, g: (b, 0, 0)),              # residual
        pl.BlockSpec((1, d_model), lambda b, g: (0, 0)),                          # LN gamma
        pl.BlockSpec((1, d_model), lambda b, g: (0, 0)),                          # LN beta
    ]
    args += [w_o3, b_o.reshape(1, d_model), res_bq,
             ln_g.reshape(1, d_model), ln_b.reshape(1, d_model)]

    return pl.pallas_call(
        kernel,
        out_shape=jax.ShapeDtypeStruct((bsz, qlen, d_model), out_dtype),
        grid=(bsz, grp),
        in_specs=in_specs,
        out_specs=pl.BlockSpec((None, qlen, d_model), lambda b, g: (b, 0, 0)),
        scratch_shapes=[pltpu.VMEM((qlen, d_model), jnp.float32)],
        compiler_params=pltpu.CompilerParams(
            dimension_semantics=("parallel", "arbitrary"),
            vmem_limit_bytes=_VMEM_LIMIT),
    )(*args)


# --------------------------------------------------------------------------
# Full forward (post-norm path, eval mode).
# --------------------------------------------------------------------------
@functools.partial(jax.jit, static_argnames=("n_head", "d_head", "assume_causal", "eps"))
def rel_mha_forward(w, r, r_w_bias, r_r_bias, attn_mask, params, *, n_head, d_head,
                    assume_causal=False, eps=1e-5):
    """RelPartialLearnableMultiHeadAttn forward (pre_lnorm=False, eval mode).
    w: (qlen, bsz, d_model), r: (rlen, d_model) with rlen == qlen (no memory).
    Linear weights are stored already transposed: (in_features, out_features)."""
    qlen, bsz, d_model = w.shape
    rlen = r.shape[0]
    if rlen != qlen:
        raise ValueError("this module has no memory: rlen must equal qlen")
    w_qkv, b_qkv, w_r, b_r, w_o, b_o, ln_g, ln_b = params
    scale = 1.0 / d_head ** 0.5
    hb = _heads_per_block(n_head, d_head)

    # Single small transpose so attention / LayerNorm output tiles are lane-dense
    # and the residual streams in the same row order.  q/k/v/r/attn_vec never
    # round-trip through HBM in a transposed layout.
    w_bq = jnp.transpose(w, (1, 0, 2))                 # (bsz, qlen, d_model)
    x2d = w_bq.reshape(bsz * qlen, d_model)

    w_heads = _linear(x2d, w_qkv, b_qkv)               # (bsz*qlen, 3*nh*dh)
    r_head_k = _linear(r, w_r, b_r)                    # (rlen, nh*dh)

    wh5 = w_heads.reshape(bsz, qlen, 3, n_head, d_head)   # free views
    rk3 = r_head_k.reshape(rlen, n_head, d_head)
    w_o3 = w_o.reshape(n_head, d_head, d_model)

    if assume_causal:
        mask = None                                     # built in-kernel from iota
    else:
        if attn_mask is None:
            raise NotImplementedError("attn_mask is required (as in the PyTorch module)")
        if attn_mask.ndim not in (2, 3):
            raise ValueError("attn_mask must be 2-D or 3-D")
        mask = attn_mask.astype(jnp.int8)               # 4x less traffic than int32

    out_bq = _fused_rel_attention(wh5, rk3, r_w_bias, r_r_bias, mask, w_o3, b_o,
                                  w_bq, ln_g, ln_b, scale=scale, eps=eps, hb=hb,
                                  out_dtype=w.dtype)
    return jnp.transpose(out_bq, (1, 0, 2))             # (qlen, bsz, d_model)


# --------------------------------------------------------------------------
# Pure-JAX reference (exact PyTorch math, incl. the original _rel_shift).
# --------------------------------------------------------------------------
def _ref_forward(w, r, r_w_bias, r_r_bias, attn_mask, params, *, n_head, d_head):
    qlen, bsz, d_model = w.shape
    rlen = r.shape[0]
    w_qkv, b_qkv, w_r, b_r, w_o, b_o, ln_g, ln_b = params
    scale = 1.0 / d_head ** 0.5

    w_heads = w.reshape(-1, d_model) @ w_qkv + b_qkv
    r_head_k = (r @ w_r + b_r).reshape(rlen, n_head, d_head)
    w_heads = w_heads.reshape(qlen, bsz, 3, n_head, d_head)
    w_head_q, w_head_k, w_head_v = w_heads[:, :, 0], w_heads[:, :, 1], w_heads[:, :, 2]

    AC = jnp.einsum('ibnd,jbnd->bnij', w_head_q + r_w_bias, w_head_k)
    BD = jnp.einsum('ibnd,jnd->bnij', w_head_q + r_r_bias, r_head_k)
    b_, n_, q_, k_ = BD.shape
    zero_pad = jnp.zeros((b_, n_, q_, 1), BD.dtype)
    BD = jnp.concatenate([zero_pad, BD], axis=3).reshape(b_, n_, k_ + 1, q_)
    BD = BD[:, :, 1:, :].reshape(b_, n_, q_, k_)

    score = scale * (AC + BD)
    m = attn_mask.astype(bool)
    score = jnp.where(m[None, None] if m.ndim == 2 else m[:, None], -jnp.inf, score)
    prob = jax.nn.softmax(score, axis=3)
    attn_vec = jnp.einsum('bnij,jbnd->ibnd', prob, w_head_v).reshape(qlen, bsz, n_head * d_head)
    attn_out = attn_vec @ w_o + b_o

    s = w + attn_out
    mu = s.mean(-1, keepdims=True)
    var = ((s - mu) ** 2).mean(-1, keepdims=True)
    return (s - mu) / jnp.sqrt(var + 1e-5) * ln_g + ln_b


if __name__ == "__main__":
    n_head, d_head, d_model = 2, 64, 128
    qlen, bsz = 8, 2
    rlen = qlen

    key = jax.random.PRNGKey(0)
    ks = jax.random.split(key, 12)
    w = jax.random.normal(ks[0], (qlen, bsz, d_model), jnp.float32)
    r = jax.random.normal(ks[1], (rlen, d_model), jnp.float32)
    r_w_bias = 0.1 * jax.random.normal(ks[2], (n_head, d_head), jnp.float32)
    r_r_bias = 0.1 * jax.random.normal(ks[3], (n_head, d_head), jnp.float32)

    sd = 0.1
    w_qkv = sd * jax.random.normal(ks[4], (d_model, 3 * n_head * d_head), jnp.float32)
    b_qkv = sd * jax.random.normal(ks[5], (3 * n_head * d_head,), jnp.float32)
    w_r = sd * jax.random.normal(ks[6], (d_model, n_head * d_head), jnp.float32)
    b_r = sd * jax.random.normal(ks[7], (n_head * d_head,), jnp.float32)
    w_o = sd * jax.random.normal(ks[8], (n_head * d_head, d_model), jnp.float32)
    b_o = sd * jax.random.normal(ks[9], (d_model,), jnp.float32)
    ln_g = jnp.ones((d_model,), jnp.float32) + 0.05 * jax.random.normal(ks[10], (d_model,), jnp.float32)
    ln_b = 0.05 * jax.random.normal(ks[11], (d_model,), jnp.float32)
    params = (w_qkv, b_qkv, w_r, b_r, w_o, b_o, ln_g, ln_b)

    # Standard Transformer-XL causal mask (no memory): mask key j > query i.
    attn_mask = jnp.triu(jnp.ones((qlen, rlen), jnp.int32), k=1)

    # f32 run vs. pure-JAX reference (approx-reciprocal softmax => loose-ish tol).
    out = rel_mha_forward(w, r, r_w_bias, r_r_bias, attn_mask, params,
                          n_head=n_head, d_head=d_head)
    out = jax.block_until_ready(out)
    ref = _ref_forward(w, r, r_w_bias, r_r_bias, attn_mask, params,
                       n_head=n_head, d_head=d_head)
    assert out.shape == (qlen, bsz, d_model)
    err = float(jnp.max(jnp.abs(out - ref)))
    assert err < 3e-2, f"f32 max abs err = {err}"

    # In-kernel iota causal mask (no mask DMA) must match the explicit-mask run.
    out_causal = rel_mha_forward(w, r, r_w_bias, r_r_bias, None, params,
                                 n_head=n_head, d_head=d_head, assume_causal=True)
    out_causal = jax.block_until_ready(out_causal)
    err_c = float(jnp.max(jnp.abs(out_causal - out)))
    assert err_c < 1e-5, f"causal-mask path err = {err_c}"

    # bf16 MXU-operand run (f32 accumulation / softmax / LayerNorm statistics).
    bf = jnp.bfloat16
    params_bf = tuple(p.astype(bf) for p in params)
    out_bf = rel_mha_forward(w.astype(bf), r.astype(bf), r_w_bias.astype(bf),
                             r_r_bias.astype(bf), attn_mask, params_bf,
                             n_head=n_head, d_head=d_head)
    out_bf = jax.block_until_ready(out_bf).astype(jnp.float32)
    err_bf = float(jnp.max(jnp.abs(out_bf - ref)))
    assert out_bf.shape == (qlen, bsz, d_model)
    assert bool(jnp.all(jnp.isfinite(out_bf))) and err_bf < 0.25, \
        f"bf16 max abs err = {err_bf}"

    print("KERNEL_OK")
</pallas_src>

<mosaic_0001>
module attributes {stable_mosaic.version = 11 : i64} {
  func.func @_linear_kernel(%arg0: i32, %arg1: memref<16x128xf32, #tpu.memory_space<vmem>>, %arg2: memref<128x384xf32, #tpu.memory_space<vmem>>, %arg3: memref<1x384xf32, #tpu.memory_space<vmem>>, %arg4: memref<16x384xf32, #tpu.memory_space<vmem>>) attributes {dimension_semantics = [#tpu.dimension_semantics<parallel>], iteration_bounds = array<i64: 1>, scalar_prefetch = 0 : i64, scratch_operands = 0 : i64, tpu.core_type = #tpu.core_type<tc>, window_params = [{transform_indices = @transform_0, window_bounds = array<i64: 16, 128>}, {pipeline_mode = #tpu.pipeline_mode<synchronous>, transform_indices = @transform_1, window_bounds = array<i64: 128, 384>}, {pipeline_mode = #tpu.pipeline_mode<synchronous>, transform_indices = @transform_2, window_bounds = array<i64: 1, 384>}, {transform_indices = @transform_3, window_bounds = array<i64: 16, 384>}]} {
    %c0 = arith.constant 0 : index
    %c0_0 = arith.constant 0 : index
    %0 = vector.load %arg1[%c0, %c0_0] : memref<16x128xf32, #tpu.memory_space<vmem>>, vector<16x128xf32>
    %c0_1 = arith.constant 0 : index
    %c0_2 = arith.constant 0 : index
    %1 = vector.load %arg2[%c0_1, %c0_2] : memref<128x384xf32, #tpu.memory_space<vmem>>, vector<128x384xf32>
    %cst = arith.constant dense<0.000000e+00> : vector<16x384xf32>
    %2 = tpu.matmul %0, %1, %cst {dimension_numbers = #tpu.dot_dimension_numbers<[1], [0], [0], [1], [0, 0, 1, 1], [], []>} : vector<16x128xf32>, vector<128x384xf32>, vector<16x384xf32> -> vector<16x384xf32>
    %c0_3 = arith.constant 0 : index
    %c0_4 = arith.constant 0 : index
    %3 = vector.load %arg3[%c0_3, %c0_4] : memref<1x384xf32, #tpu.memory_space<vmem>>, vector<1x384xf32>
    %4 = vector.broadcast %3 : vector<1x384xf32> to vector<16x384xf32>
    %5 = arith.addf %2, %4 : vector<16x384xf32>
    %c0_5 = arith.constant 0 : index
    %c0_6 = arith.constant 0 : index
    %6 = vector.load %arg4[%c0_5, %c0_6] : memref<16x384xf32, #tpu.memory_space<vmem>>, vector<16x384xf32>
    tpu.vector_store %arg4[%c0_5, %c0_6], %5 {strides = array<i32>} : memref<16x384xf32, #tpu.memory_space<vmem>>, vector<16x384xf32>,
    return
  }
  func.func @transform_0(%arg0: i32) -> (i32, i32) {
    %c0_i32 = arith.constant 0 : i32
    %c0_i32_0 = arith.constant 0 : i32
    return %arg0, %c0_i32 : i32, i32
  }
  func.func @transform_1(%arg0: i32) -> (i32, i32) {
    %c0_i32 = arith.constant 0 : i32
    %c0_i32_0 = arith.constant 0 : i32
    %c0_i32_1 = arith.constant 0 : i32
    return %c0_i32, %c0_i32_0 : i32, i32
  }
  func.func @transform_2(%arg0: i32) -> (i32, i32) {
    %c0_i32 = arith.constant 0 : i32
    %c0_i32_0 = arith.constant 0 : i32
    %c0_i32_1 = arith.constant 0 : i32
    return %c0_i32, %c0_i32_0 : i32, i32
  }
  func.func @transform_3(%arg0: i32) -> (i32, i32) {
    %c0_i32 = arith.constant 0 : i32
    %c0_i32_0 = arith.constant 0 : i32
    return %arg0, %c0_i32 : i32, i32
  }
}

module attributes {stable_mosaic.version = 11 : i64} {
  func.func @_linear_kernel(%arg0: i32, %arg1: memref<8x128xf32, #tpu.memory_space<vmem>>, %arg2: memref<128x128xf32, #tpu.memory_space<vmem>>, %arg3: memref<1x128xf32, #tpu.memory_space<vmem>>, %arg4: memref<8x128xf32, #tpu.memory_space<vmem>>) attributes {dimension_semantics = [#tpu.dimension_semantics<parallel>], iteration_bounds = array<i64: 1>, scalar_prefetch = 0 : i64, scratch_operands = 0 : i64, tpu.core_type = #tpu.core_type<tc>, window_params = [{transform_indices = @transform_0, window_bounds = array<i64: 8, 128>}, {pipeline_mode = #tpu.pipeline_mode<synchronous>, transform_indices = @transform_1, window_bounds = array<i64: 128, 128>}, {pipeline_mode = #tpu.pipeline_mode<synchronous>, transform_indices = @transform_2, window_bounds = array<i64: 1, 128>}, {transform_indices = @transform_3, window_bounds = array<i64: 8, 128>}]} {
    %c0 = arith.constant 0 : index
    %c0_0 = arith.constant 0 : index
    %0 = vector.load %arg1[%c0, %c0_0] : memref<8x128xf32, #tpu.memory_space<vmem>>, vector<8x128xf32>
    %c0_1 = arith.constant 0 : index
    %c0_2 = arith.constant 0 : index
    %1 = vector.load %arg2[%c0_1, %c0_2] : memref<128x128xf32, #tpu.memory_space<vmem>>, vector<128x128xf32>
    %cst = arith.constant dense<0.000000e+00> : vector<8x128xf32>
    %2 = tpu.matmul %0, %1, %cst {dimension_numbers = #tpu.dot_dimension_numbers<[1], [0], [0], [1], [0, 0, 1, 1], [], []>} : vector<8x128xf32>, vector<128x128xf32>, vector<8x128xf32> -> vector<8x128xf32>
    %c0_3 = arith.constant 0 : index
    %c0_4 = arith.constant 0 : index
    %3 = vector.load %arg3[%c0_3, %c0_4] : memref<1x128xf32, #tpu.memory_space<vmem>>, vector<1x128xf32>
    %4 = vector.broadcast %3 : vector<1x128xf32> to vector<8x128xf32>
    %5 = arith.addf %2, %4 : vector<8x128xf32>
    %c0_5 = arith.constant 0 : index
    %c0_6 = arith.constant 0 : index
    %6 = vector.load %arg4[%c0_5, %c0_6] : memref<8x128xf32, #tpu.memory_space<vmem>>, vector<8x128xf32>
    tpu.vector_store %arg4[%c0_5, %c0_6], %5 {strides = array<i32>} : memref<8x128xf32, #tpu.memory_space<vmem>>, vector<8x128xf32>,
    return
  }
  func.func @transform_0(%arg0: i32) -> (i32, i32) {
    %c0_i32 = arith.constant 0 : i32
    %c0_i32_0 = arith.constant 0 : i32
    return %arg0, %c0_i32 : i32, i32
  }
  func.func @transform_1(%arg0: i32) -> (i32, i32) {
    %c0_i32 = arith.constant 0 : i32
    %c0_i32_0 = arith.constant 0 : i32
    %c0_i32_1 = arith.constant 0 : i32
    return %c0_i32, %c0_i32_0 : i32, i32
  }
  func.func @transform_2(%arg0: i32) -> (i32, i32) {
    %c0_i32 = arith.constant 0 : i32
    %c0_i32_0 = arith.constant 0 : i32
    %c0_i32_1 = arith.constant 0 : i32
    return %c0_i32, %c0_i32_0 : i32, i32
  }
  func.func @transform_3(%arg0: i32) -> (i32, i32) {
    %c0_i32 = arith.constant 0 : i32
    %c0_i32_0 = arith.constant 0 : i32
    return %arg0, %c0_i32 : i32, i32
  }
}

module attributes {stable_mosaic.version = 11 : i64} {
  func.func @_rel_attn_out_ln_kernel(%arg0: i32, %arg1: i32, %arg2: memref<1x8x3x2x64xf32, #tpu.memory_space<vmem>>, %arg3: memref<8x2x64xf32, #tpu.memory_space<vmem>>, %arg4: memref<2x64xf32, #tpu.memory_space<vmem>>, %arg5: memref<2x64xf32, #tpu.memory_space<vmem>>, %arg6: memref<8x8xi8, #tpu.memory_space<vmem>>, %arg7: memref<2x64x128xf32, #tpu.memory_space<vmem>>, %arg8: memref<1x128xf32, #tpu.memory_space<vmem>>, %arg9: memref<1x8x128xf32, #tpu.memory_space<vmem>>, %arg10: memref<1x128xf32, #tpu.memory_space<vmem>>, %arg11: memref<1x128xf32, #tpu.memory_space<vmem>>, %arg12: memref<1x8x128xf32, #tpu.memory_space<vmem>>, %arg13: memref<8x128xf32, #tpu.memory_space<vmem>>) attributes {dimension_semantics = [#tpu.dimension_semantics<parallel>, #tpu.dimension_semantics<arbitrary>], iteration_bounds = array<i64: 2, 1>, scalar_prefetch = 0 : i64, scratch_operands = 1 : i64, tpu.core_type = #tpu.core_type<tc>, window_params = [{transform_indices = @transform_0, window_bounds = array<i64: 1, 8, 3, 2, 64>}, {transform_indices = @transform_1, window_bounds = array<i64: 8, 2, 64>}, {transform_indices = @transform_2, window_bounds = array<i64: 2, 64>}, {transform_indices = @transform_3, window_bounds = array<i64: 2, 64>}, {pipeline_mode = #tpu.pipeline_mode<synchronous>, transform_indices = @transform_4, window_bounds = array<i64: 8, 8>}, {transform_indices = @transform_5, window_bounds = array<i64: 2, 64, 128>}, {pipeline_mode = #tpu.pipeline_mode<synchronous>, transform_indices = @transform_6, window_bounds = array<i64: 1, 128>}, {transform_indices = @transform_7, window_bounds = array<i64: 1, 8, 128>}, {pipeline_mode = #tpu.pipeline_mode<synchronous>, transform_indices = @transform_8, window_bounds = array<i64: 1, 128>}, {pipeline_mode = #tpu.pipeline_mode<synchronous>, transform_indices = @transform_9, window_bounds = array<i64: 1, 128>}, {transform_indices = @transform_10, window_bounds = array<i64: 1, 8, 128>}]} {
    %c0_i32 = arith.constant 0 : i32
    %0 = arith.cmpi eq, %arg1, %c0_i32 : i32
    %1 = arith.extui %0 : i1 to i32
    %c0_i32_0 = arith.constant 0 : i32
    %2 = arith.cmpi ne, %1, %c0_i32_0 : i32
    scf.if %2 {
      %cst_75 = arith.constant 0.000000e+00 : f32
      %96 = vector.broadcast %cst_75 : f32 to vector<8x128xf32>
      %c0_76 = arith.constant 0 : index
      %c0_77 = arith.constant 0 : index
      %97 = vector.load %arg13[%c0_76, %c0_77] : memref<8x128xf32, #tpu.memory_space<vmem>>, vector<8x128xf32>
      tpu.vector_store %arg13[%c0_76, %c0_77], %96 {strides = array<i32>} : memref<8x128xf32, #tpu.memory_space<vmem>>, vector<8x128xf32>,
    } else {
    }
    %c0 = arith.constant 0 : index
    %c0_1 = arith.constant 0 : index
    %3 = vector.load %arg6[%c0, %c0_1] : memref<8x8xi8, #tpu.memory_space<vmem>>, vector<8x8xi8>
    %c0_i8 = arith.constant 0 : i8
    %4 = vector.broadcast %c0_i8 : i8 to vector<8x8xi8>
    %5 = arith.cmpi ne, %3, %4 : vector<8x8xi8>
    %cst = arith.constant 0.000000e+00 : f32
    %6 = vector.broadcast %cst : f32 to vector<8x120xf32>
    %cst_2 = arith.constant 0.000000e+00 : f32
    %7 = vector.broadcast %cst_2 : f32 to vector<8x128xf32>
    %c0_3 = arith.constant 0 : index
    %c0_4 = arith.constant 0 : index
    %c0_5 = arith.constant 0 : index
    %c0_6 = arith.constant 0 : index
    %c0_7 = arith.constant 0 : index
    %8 = vector.load %arg2[%c0_3, %c0_4, %c0_5, %c0_6, %c0_7] : memref<1x8x3x2x64xf32, #tpu.memory_space<vmem>>, vector<1x8x1x1x64xf32>
    %9 = vector.shape_cast %8 : vector<1x8x1x1x64xf32> to vector<8x64xf32>
    %c0_8 = arith.constant 0 : index
    %c0_9 = arith.constant 0 : index
    %c1 = arith.constant 1 : index
    %c0_10 = arith.constant 0 : index
    %c0_11 = arith.constant 0 : index
    %10 = vector.load %arg2[%c0_8, %c0_9, %c1, %c0_10, %c0_11] : memref<1x8x3x2x64xf32, #tpu.memory_space<vmem>>, vector<1x8x1x1x64xf32>
    %11 = vector.shape_cast %10 : vector<1x8x1x1x64xf32> to vector<8x64xf32>
    %c0_12 = arith.constant 0 : index
    %c0_13 = arith.constant 0 : index
    %c2 = arith.constant 2 : index
    %c0_14 = arith.constant 0 : index
    %c0_15 = arith.constant 0 : index
    %12 = vector.load %arg2[%c0_12, %c0_13, %c2, %c0_14, %c0_15] : memref<1x8x3x2x64xf32, #tpu.memory_space<vmem>>, vector<1x8x1x1x64xf32>
    %13 = vector.shape_cast %12 : vector<1x8x1x1x64xf32> to vector<8x64xf32>
    %c0_16 = arith.constant 0 : index
    %c0_17 = arith.constant 0 : index
    %c0_18 = arith.constant 0 : index
    %14 = vector.load %arg3[%c0_16, %c0_17, %c0_18] : memref<8x2x64xf32, #tpu.memory_space<vmem>>, vector<8x1x64xf32>
    %15 = vector.shape_cast %14 : vector<8x1x64xf32> to vector<8x64xf32>
    %c0_19 = arith.constant 0 : index
    %c0_20 = arith.constant 0 : index
    %16 = vector.load %arg4[%c0_19, %c0_20] : memref<2x64xf32, #tpu.memory_space<vmem>>, vector<1x64xf32>
    %17 = vector.broadcast %16 : vector<1x64xf32> to vector<8x64xf32>
    %18 = arith.addf %9, %17 : vector<8x64xf32>
    %c0_21 = arith.constant 0 : index
    %c0_22 = arith.constant 0 : index
    %19 = vector.load %arg5[%c0_21, %c0_22] : memref<2x64xf32, #tpu.memory_space<vmem>>, vector<1x64xf32>
    %20 = vector.broadcast %19 : vector<1x64xf32> to vector<8x64xf32>
    %21 = arith.addf %9, %20 : vector<8x64xf32>
    %cst_23 = arith.constant dense<0.000000e+00> : vector<8x8xf32>
    %22 = tpu.matmul %18, %11, %cst_23 {dimension_numbers = #tpu.dot_dimension_numbers<[1], [1], [0], [0], [0, 0, 1, 0], [], []>} : vector<8x64xf32>, vector<8x64xf32>, vector<8x8xf32> -> vector<8x8xf32>
    %cst_24 = arith.constant dense<0.000000e+00> : vector<8x8xf32>
    %23 = tpu.matmul %21, %15, %cst_24 {dimension_numbers = #tpu.dot_dimension_numbers<[1], [1], [0], [0], [0, 0, 1, 0], [], []>} : vector<8x64xf32>, vector<8x64xf32>, vector<8x8xf32> -> vector<8x8xf32>
    %24 = vector.extract_strided_slice %23 {offsets = [0, 7], sizes = [8, 1], strides = [1, 1]} : vector<8x8xf32> to vector<8x1xf32>
    %25 = vector.extract_strided_slice %23 {offsets = [0, 0], sizes = [8, 7], strides = [1, 1]} : vector<8x8xf32> to vector<8x7xf32>
    %26 = tpu.concatenate %24, %6, %25 in 1 : vector<8x1xf32>, vector<8x120xf32>, vector<8x7xf32> -> vector<8x128xf32>
    %c0_i32_25 = arith.constant 0 : i32
    %27 = tpu.dynamic_rotate %26 by %c0_i32_25 dim 1 {stride = 1 : si32, stride_dimension = 0 : si32} : vector<8x128xf32>, i32 -> vector<8x128xf32>
    %28 = vector.extract_strided_slice %27 {offsets = [0, 0], sizes = [8, 8], strides = [1, 1]} : vector<8x128xf32> to vector<8x8xf32>
    %29 = arith.addf %22, %28 : vector<8x8xf32>
    %cst_26 = arith.constant 1.250000e-01 : f32
    %30 = vector.broadcast %cst_26 : f32 to vector<8x8xf32>
    %31 = arith.mulf %29, %30 : vector<8x8xf32>
    %cst_27 = arith.constant 0xFF800000 : f32
    %32 = vector.broadcast %cst_27 : f32 to vector<8x8xf32>
    %33 = arith.select %5, %32, %31 : vector<8x8xi1>, vector<8x8xf32>
    %cst_28 = arith.constant dense<0xFF800000> : vector<8xf32>
    %34 = vector.multi_reduction <maximumf>, %33, %cst_28 [1] : vector<8x8xf32> to vector<8xf32>
    %35 = vector.shape_cast %34 : vector<8xf32> to vector<8x1xf32>
    %36 = vector.broadcast %35 : vector<8x1xf32> to vector<8x8xf32>
    %37 = arith.subf %33, %36 : vector<8x8xf32>
    %38 = math.exp %37 : vector<8x8xf32>
    %cst_29 = arith.constant dense<0.000000e+00> : vector<8xf32>
    %39 = vector.multi_reduction <add>, %38, %cst_29 [1] : vector<8x8xf32> to vector<8xf32>
    %40 = vector.shape_cast %39 : vector<8xf32> to vector<8x1xf32>
    %41 = tpu.reciprocal %40 {approx = true} : vector<8x1xf32> -> vector<8x1xf32>
    %42 = vector.broadcast %41 : vector<8x1xf32> to vector<8x8xf32>
    %43 = arith.mulf %38, %42 : vector<8x8xf32>
    %cst_30 = arith.constant dense<0.000000e+00> : vector<8x64xf32>
    %44 = tpu.matmul %43, %13, %cst_30 {dimension_numbers = #tpu.dot_dimension_numbers<[1], [0], [0], [1], [0, 0, 1, 1], [], []>} : vector<8x8xf32>, vector<8x64xf32>, vector<8x64xf32> -> vector<8x64xf32>
    %c0_31 = arith.constant 0 : index
    %c0_32 = arith.constant 0 : index
    %c0_33 = arith.constant 0 : index
    %45 = vector.load %arg7[%c0_31, %c0_32, %c0_33] : memref<2x64x128xf32, #tpu.memory_space<vmem>>, vector<1x64x128xf32>
    %46 = vector.shape_cast %45 : vector<1x64x128xf32> to vector<64x128xf32>
    %cst_34 = arith.constant dense<0.000000e+00> : vector<8x128xf32>
    %47 = tpu.matmul %44, %46, %cst_34 {dimension_numbers = #tpu.dot_dimension_numbers<[1], [0], [0], [1], [0, 0, 1, 1], [], []>} : vector<8x64xf32>, vector<64x128xf32>, vector<8x128xf32> -> vector<8x128xf32>
    %48 = arith.addf %7, %47 : vector<8x128xf32>
    %c0_35 = arith.constant 0 : index
    %c0_36 = arith.constant 0 : index
    %c0_37 = arith.constant 0 : index
    %c1_38 = arith.constant 1 : index
    %c0_39 = arith.constant 0 : index
    %49 = vector.load %arg2[%c0_35, %c0_36, %c0_37, %c1_38, %c0_39] : memref<1x8x3x2x64xf32, #tpu.memory_space<vmem>>, vector<1x8x1x1x64xf32>
    %50 = vector.shape_cast %49 : vector<1x8x1x1x64xf32> to vector<8x64xf32>
    %c0_40 = arith.constant 0 : index
    %c0_41 = arith.constant 0 : index
    %c1_42 = arith.constant 1 : index
    %c1_43 = arith.constant 1 : index
    %c0_44 = arith.constant 0 : index
    %51 = vector.load %arg2[%c0_40, %c0_41, %c1_42, %c1_43, %c0_44] : memref<1x8x3x2x64xf32, #tpu.memory_space<vmem>>, vector<1x8x1x1x64xf32>
    %52 = vector.shape_cast %51 : vector<1x8x1x1x64xf32> to vector<8x64xf32>
    %c0_45 = arith.constant 0 : index
    %c0_46 = arith.constant 0 : index
    %c2_47 = arith.constant 2 : index
    %c1_48 = arith.constant 1 : index
    %c0_49 = arith.constant 0 : index
    %53 = vector.load %arg2[%c0_45, %c0_46, %c2_47, %c1_48, %c0_49] : memref<1x8x3x2x64xf32, #tpu.memory_space<vmem>>, vector<1x8x1x1x64xf32>
    %54 = vector.shape_cast %53 : vector<1x8x1x1x64xf32> to vector<8x64xf32>
    %c0_50 = arith.constant 0 : index
    %c1_51 = arith.constant 1 : index
    %c0_52 = arith.constant 0 : index
    %55 = vector.load %arg3[%c0_50, %c1_51, %c0_52] : memref<8x2x64xf32, #tpu.memory_space<vmem>>, vector<8x1x64xf32>
    %56 = vector.shape_cast %55 : vector<8x1x64xf32> to vector<8x64xf32>
    %c1_53 = arith.constant 1 : index
    %c0_54 = arith.constant 0 : index
    %57 = vector.load %arg4[%c1_53, %c0_54] : memref<2x64xf32, #tpu.memory_space<vmem>>, vector<1x64xf32>
    %58 = vector.broadcast %57 : vector<1x64xf32> to vector<8x64xf32>
    %59 = arith.addf %50, %58 : vector<8x64xf32>
    %c1_55 = arith.constant 1 : index
    %c0_56 = arith.constant 0 : index
    %60 = vector.load %arg5[%c1_55, %c0_56] : memref<2x64xf32, #tpu.memory_space<vmem>>, vector<1x64xf32>
    %61 = vector.broadcast %60 : vector<1x64xf32> to vector<8x64xf32>
    %62 = arith.addf %50, %61 : vector<8x64xf32>
    %cst_57 = arith.constant dense<0.000000e+00> : vector<8x8xf32>
    %63 = tpu.matmul %59, %52, %cst_57 {dimension_numbers = #tpu.dot_dimension_numbers<[1], [1], [0], [0], [0, 0, 1, 0], [], []>} : vector<8x64xf32>, vector<8x64xf32>, vector<8x8xf32> -> vector<8x8xf32>
    %cst_58 = arith.constant dense<0.000000e+00> : vector<8x8xf32>
    %64 = tpu.matmul %62, %56, %cst_58 {dimension_numbers = #tpu.dot_dimension_numbers<[1], [1], [0], [0], [0, 0, 1, 0], [], []>} : vector<8x64xf32>, vector<8x64xf32>, vector<8x8xf32> -> vector<8x8xf32>
    %65 = vector.extract_strided_slice %64 {offsets = [0, 7], sizes = [8, 1], strides = [1, 1]} : vector<8x8xf32> to vector<8x1xf32>
    %66 = vector.extract_strided_slice %64 {offsets = [0, 0], sizes = [8, 7], strides = [1, 1]} : vector<8x8xf32> to vector<8x7xf32>
    %67 = tpu.concatenate %65, %6, %66 in 1 : vector<8x1xf32>, vector<8x120xf32>, vector<8x7xf32> -> vector<8x128xf32>
    %c0_i32_59 = arith.constant 0 : i32
    %68 = tpu.dynamic_rotate %67 by %c0_i32_59 dim 1 {stride = 1 : si32, stride_dimension = 0 : si32} : vector<8x128xf32>, i32 -> vector<8x128xf32>
    %69 = vector.extract_strided_slice %68 {offsets = [0, 0], sizes = [8, 8], strides = [1, 1]} : vector<8x128xf32> to vector<8x8xf32>
    %70 = arith.addf %63, %69 : vector<8x8xf32>
    %cst_60 = arith.constant 1.250000e-01 : f32
    %71 = vector.broadcast %cst_60 : f32 to vector<8x8xf32>
    %72 = arith.mulf %70, %71 : vector<8x8xf32>
    %cst_61 = arith.constant 0xFF800000 : f32
    %73 = vector.broadcast %cst_61 : f32 to vector<8x8xf32>
    %74 = arith.select %5, %73, %72 : vector<8x8xi1>, vector<8x8xf32>
    %cst_62 = arith.constant dense<0xFF800000> : vector<8xf32>
    %75 = vector.multi_reduction <maximumf>, %74, %cst_62 [1] : vector<8x8xf32> to vector<8xf32>
    %76 = vector.shape_cast %75 : vector<8xf32> to vector<8x1xf32>
    %77 = vector.broadcast %76 : vector<8x1xf32> to vector<8x8xf32>
    %78 = arith.subf %74, %77 : vector<8x8xf32>
    %79 = math.exp %78 : vector<8x8xf32>
    %cst_63 = arith.constant dense<0.000000e+00> : vector<8xf32>
    %80 = vector.multi_reduction <add>, %79, %cst_63 [1] : vector<8x8xf32> to vector<8xf32>
    %81 = vector.shape_cast %80 : vector<8xf32> to vector<8x1xf32>
    %82 = tpu.reciprocal %81 {approx = true} : vector<8x1xf32> -> vector<8x1xf32>
    %83 = vector.broadcast %82 : vector<8x1xf32> to vector<8x8xf32>
    %84 = arith.mulf %79, %83 : vector<8x8xf32>
    %cst_64 = arith.constant dense<0.000000e+00> : vector<8x64xf32>
    %85 = tpu.matmul %84, %54, %cst_64 {dimension_numbers = #tpu.dot_dimension_numbers<[1], [0], [0], [1], [0, 0, 1, 1], [], []>} : vector<8x8xf32>, vector<8x64xf32>, vector<8x64xf32> -> vector<8x64xf32>
    %c1_65 = arith.constant 1 : index
    %c0_66 = arith.constant 0 : index
    %c0_67 = arith.constant 0 : index
    %86 = vector.load %arg7[%c1_65, %c0_66, %c0_67] : memref<2x64x128xf32, #tpu.memory_space<vmem>>, vector<1x64x128xf32>
    %87 = vector.shape_cast %86 : vector<1x64x128xf32> to vector<64x128xf32>
    %cst_68 = arith.constant dense<0.000000e+00> : vector<8x128xf32>
    %88 = tpu.matmul %85, %87, %cst_68 {dimension_numbers = #tpu.dot_dimension_numbers<[1], [0], [0], [1], [0, 0, 1, 1], [], []>} : vector<8x64xf32>, vector<64x128xf32>, vector<8x128xf32> -> vector<8x128xf32>
    %89 = arith.addf %48, %88 : vector<8x128xf32>
    %c0_69 = arith.constant 0 : index
    %c0_70 = arith.constant 0 : index
    %90 = vector.load %arg13[%c0_69, %c0_70] : memref<8x128xf32, #tpu.memory_space<vmem>>, vector<8x128xf32>
    %91 = arith.addf %90, %89 : vector<8x128xf32>
    %c0_71 = arith.constant 0 : index
    %c0_72 = arith.constant 0 : index
    %92 = vector.load %arg13[%c0_71, %c0_72] : memref<8x128xf32, #tpu.memory_space<vmem>>, vector<8x128xf32>
    tpu.vector_store %arg13[%c0_71, %c0_72], %91 {strides = array<i32>} : memref<8x128xf32, #tpu.memory_space<vmem>>, vector<8x128xf32>,
    %c0_i32_73 = arith.constant 0 : i32
    %93 = arith.cmpi eq, %arg1, %c0_i32_73 : i32
    %94 = arith.extui %93 : i1 to i32
    %c0_i32_74 = arith.constant 0 : i32
    %95 = arith.cmpi ne, %94, %c0_i32_74 : i32
    scf.if %95 {
      %c0_75 = arith.constant 0 : index
      %c0_76 = arith.constant 0 : index
      %96 = vector.load %arg13[%c0_75, %c0_76] : memref<8x128xf32, #tpu.memory_space<vmem>>, vector<8x128xf32>
      %c0_77 = arith.constant 0 : index
      %c0_78 = arith.constant 0 : index
      %97 = vector.load %arg8[%c0_77, %c0_78] : memref<1x128xf32, #tpu.memory_space<vmem>>, vector<1x128xf32>
      %98 = vector.broadcast %97 : vector<1x128xf32> to vector<8x128xf32>
      %99 = arith.addf %96, %98 : vector<8x128xf32>
      %c0_79 = arith.constant 0 : index
      %c0_80 = arith.constant 0 : index
      %c0_81 = arith.constant 0 : index
      %100 = vector.load %arg9[%c0_79, %c0_80, %c0_81] : memref<1x8x128xf32, #tpu.memory_space<vmem>>, vector<1x8x128xf32>
      %101 = vector.shape_cast %100 : vector<1x8x128xf32> to vector<8x128xf32>
      %102 = arith.addf %99, %101 : vector<8x128xf32>
      %cst_82 = arith.constant dense<0.000000e+00> : vector<8xf32>
      %103 = vector.multi_reduction <add>, %102, %cst_82 [1] : vector<8x128xf32> to vector<8xf32>
      %104 = vector.shape_cast %103 : vector<8xf32> to vector<8x1xf32>
      %cst_83 = arith.constant 1.280000e+02 : f32
      %105 = vector.broadcast %cst_83 : f32 to vector<8x1xf32>
      %106 = arith.divf %104, %105 : vector<8x1xf32>
      %107 = vector.broadcast %106 : vector<8x1xf32> to vector<8x128xf32>
      %108 = arith.subf %102, %107 : vector<8x128xf32>
      %109 = arith.mulf %108, %108 : vector<8x128xf32>
      %cst_84 = arith.constant dense<0.000000e+00> : vector<8xf32>
      %110 = vector.multi_reduction <add>, %109, %cst_84 [1] : vector<8x128xf32> to vector<8xf32>
      %111 = vector.shape_cast %110 : vector<8xf32> to vector<8x1xf32>
      %cst_85 = arith.constant 1.280000e+02 : f32
      %112 = vector.broadcast %cst_85 : f32 to vector<8x1xf32>
      %113 = arith.divf %111, %112 : vector<8x1xf32>
      %114 = vector.broadcast %106 : vector<8x1xf32> to vector<8x128xf32>
      %115 = arith.subf %102, %114 : vector<8x128xf32>
      %cst_86 = arith.constant 9.99999974E-6 : f32
      %116 = vector.broadcast %cst_86 : f32 to vector<8x1xf32>
      %117 = arith.addf %113, %116 : vector<8x1xf32>
      %118 = math.rsqrt %117 : vector<8x1xf32>
      %119 = vector.broadcast %118 : vector<8x1xf32> to vector<8x128xf32>
      %120 = arith.mulf %115, %119 : vector<8x128xf32>
      %c0_87 = arith.constant 0 : index
      %c0_88 = arith.constant 0 : index
      %121 = vector.load %arg10[%c0_87, %c0_88] : memref<1x128xf32, #tpu.memory_space<vmem>>, vector<1x128xf32>
      %122 = vector.broadcast %121 : vector<1x128xf32> to vector<8x128xf32>
      %123 = arith.mulf %120, %122 : vector<8x128xf32>
      %c0_89 = arith.constant 0 : index
      %c0_90 = arith.constant 0 : index
      %124 = vector.load %arg11[%c0_89, %c0_90] : memref<1x128xf32, #tpu.memory_space<vmem>>, vector<1x128xf32>
      %125 = vector.broadcast %124 : vector<1x128xf32> to vector<8x128xf32>
      %126 = arith.addf %123, %125 : vector<8x128xf32>
      %c0_91 = arith.constant 0 : index
      %c0_92 = arith.constant 0 : index
      %c0_93 = arith.constant 0 : index
      %127 = vector.load %arg12[%c0_91, %c0_92, %c0_93] : memref<1x8x128xf32, #tpu.memory_space<vmem>>, vector<1x8x128xf32>
      %128 = vector.shape_cast %127 : vector<1x8x128xf32> to vector<8x128xf32>
      %129 = vector.shape_cast %126 : vector<8x128xf32> to vector<1x8x128xf32>
      tpu.vector_store %arg12[%c0_91, %c0_92, %c0_93], %129 {strides = array<i32>} : memref<1x8x128xf32, #tpu.memory_space<vmem>>, vector<1x8x128xf32>,
    } else {
    }
    return
  }
  func.func @transform_0(%arg0: i32, %arg1: i32) -> (i32, i32, i32, i32, i32) {
    %c0_i32 = arith.constant 0 : i32
    %c0_i32_0 = arith.constant 0 : i32
    %c0_i32_1 = arith.constant 0 : i32
    %c0_i32_2 = arith.constant 0 : i32
    return %arg0, %c0_i32, %c0_i32_0, %arg1, %c0_i32_1 : i32, i32, i32, i32, i32
  }
  func.func @transform_1(%arg0: i32, %arg1: i32) -> (i32, i32, i32) {
    %c0_i32 = arith.constant 0 : i32
    %c0_i32_0 = arith.constant 0 : i32
    %c0_i32_1 = arith.constant 0 : i32
    return %c0_i32, %arg1, %c0_i32_0 : i32, i32, i32
  }
  func.func @transform_2(%arg0: i32, %arg1: i32) -> (i32, i32) {
    %c0_i32 = arith.constant 0 : i32
    %c0_i32_0 = arith.constant 0 : i32
    return %arg1, %c0_i32 : i32, i32
  }
  func.func @transform_3(%arg0: i32, %arg1: i32) -> (i32, i32) {
    %c0_i32 = arith.constant 0 : i32
    %c0_i32_0 = arith.constant 0 : i32
    return %arg1, %c0_i32 : i32, i32
  }
  func.func @transform_4(%arg0: i32, %arg1: i32) -> (i32, i32) {
    %c0_i32 = arith.constant 0 : i32
    %c0_i32_0 = arith.constant 0 : i32
    %c0_i32_1 = arith.constant 0 : i32
    return %c0_i32, %c0_i32_0 : i32, i32
  }
  func.func @transform_5(%arg0: i32, %arg1: i32) -> (i32, i32, i32) {
    %c0_i32 = arith.constant 0 : i32
    %c0_i32_0 = arith.constant 0 : i32
    %c0_i32_1 = arith.constant 0 : i32
    return %arg1, %c0_i32, %c0_i32_0 : i32, i32, i32
  }
  func.func @transform_6(%arg0: i32, %arg1: i32) -> (i32, i32) {
    %c0_i32 = arith.constant 0 : i32
    %c0_i32_0 = arith.constant 0 : i32
    %c0_i32_1 = arith.constant 0 : i32
    return %c0_i32, %c0_i32_0 : i32, i32
  }
  func.func @transform_7(%arg0: i32, %arg1: i32) -> (i32, i32, i32) {
    %c0_i32 = arith.constant 0 : i32
    %c0_i32_0 = arith.constant 0 : i32
    %c0_i32_1 = arith.constant 0 : i32
    return %arg0, %c0_i32, %c0_i32_0 : i32, i32, i32
  }
  func.func @transform_8(%arg0: i32, %arg1: i32) -> (i32, i32) {
    %c0_i32 = arith.constant 0 : i32
    %c0_i32_0 = arith.constant 0 : i32
    %c0_i32_1 = arith.constant 0 : i32
    return %c0_i32, %c0_i32_0 : i32, i32
  }
  func.func @transform_9(%arg0: i32, %arg1: i32) -> (i32, i32) {
    %c0_i32 = arith.constant 0 : i32
    %c0_i32_0 = arith.constant 0 : i32
    %c0_i32_1 = arith.constant 0 : i32
    return %c0_i32, %c0_i32_0 : i32, i32
  }
  func.func @transform_10(%arg0: i32, %arg1: i32) -> (i32, i32, i32) {
    %c0_i32 = arith.constant 0 : i32
    %c0_i32_0 = arith.constant 0 : i32
    %c0_i32_1 = arith.constant 0 : i32
    return %arg0, %c0_i32, %c0_i32_0 : i32, i32, i32
  }
}

</mosaic_0001>

<bundles_post_ra>
// kernel: rel_mha_forward.4
= control target key start
LH: loop header
LB: loop body
LE: loop exit
PB: predicated region body
PF: predicated region fallthrough
CT: control target
= control target key end

     0   :  { %v168_v0 = vmov 0.0   ;;  %vm169_vm0 = vmmov 0   ;;  %s247_s1 = inlined_call_operand.vmem [shape: f32[128,128], index: 1, kind: input, shape index: {}]   ;;  %s248_s0 = inlined_call_operand.vmem [shape: f32[8,128], index: 0, kind: input, shape index: {}]   ;;  %s249_s2 = inlined_call_operand.vmem [shape: f32[1,128], index: 2, kind: input, shape index: {}]   ;;  %s250_s3 = inlined_call_operand.vmem [shape: f32[8,128], index: 3, kind: output, shape index: {}]  }
   0x1   :  { %131 = vmatprep.subr.mxu0 %v168_v0  ;;  %v30_v1 = vld [vmem:[%s247_s1 + $0x78] sm:$0xff]  ;;  %v29_v2 = vld [vmem:[%s247_s1 + $0x70] sm:$0xff]  ;;  %163 = vmatprep.mubr.msk.f32.mxu0 %vm169_vm0, %v168_v0  ;;  %v28_v3 = vld [vmem:[%s247_s1 + $0x68] sm:$0xff] }
   0x2   :  { %132 = vmatpush3.msra.mxu0 %v30_v1  ;;  %v27_v4 = vld [vmem:[%s247_s1 + $0x60] sm:$0xff]  ;;  %v26_v5 = vld [vmem:[%s247_s1 + $0x58] sm:$0xff]  ;;  %v25_v6 = vld [vmem:[%s247_s1 + $0x50] sm:$0xff] }
   0x3   :  { %133 = vmatprep.subr.mxu0 %v168_v0  ;;  %v24_v7 = vld [vmem:[%s247_s1 + $0x48] sm:$0xff]  ;;  %v23_v8 = vld [vmem:[%s247_s1 + $0x40] sm:$0xff]  ;;  %v22_v9 = vld [vmem:[%s247_s1 + $0x38] sm:$0xff] }
   0x4   :  { %134 = vmatpush3.msra.mxu0 %v29_v2  ;;  %v21_v10 = vld [vmem:[%s247_s1 + $0x30] sm:$0xff]  ;;  %v20_v11 = vld [vmem:[%s247_s1 + $0x28] sm:$0xff]  ;;  %v19_v12 = vld [vmem:[%s247_s1 + $0x20] sm:$0xff] }
   0x5   :  { %135 = vmatprep.subr.mxu0 %v168_v0  ;;  %v18_v13 = vld [vmem:[%s247_s1 + $0x18] sm:$0xff]  ;;  %v17_v14 = vld [vmem:[%s247_s1 + $0x10] sm:$0xff]  ;;  %v16_v15 = vld [vmem:[%s247_s1 + $0x8] sm:$0xff] }
   0x6   :  { %136 = vmatpush3.msra.mxu0 %v28_v3  ;;  %v15_v16 = vld [vmem:[%s247_s1] sm:$0xff] }
   0x7   :  { %137 = vmatprep.subr.mxu0 %v168_v0  ;;  %v14_v17 = vld [vmem:[%s248_s0] sm:$0xff] }
   0x8   :  { %138 = vmatpush3.msra.mxu0 %v27_v4  ;;  %v113_v18 = vld [vmem:[%s249_s2] ss:$0 sm:$0xff] }
   0x9   :  { %139 = vmatprep.subr.mxu0 %v168_v0 }
   0xa   :  { %140 = vmatpush3.msra.mxu0 %v26_v5 }
   0xb   :  { %141 = vmatprep.subr.mxu0 %v168_v0 }
   0xc   :  { %142 = vmatpush3.msra.mxu0 %v25_v6 }
   0xd   :  { %143 = vmatprep.subr.mxu0 %v168_v0 }
   0xe   :  { %144 = vmatpush3.msra.mxu0 %v24_v7 }
   0xf   :  { %145 = vmatprep.subr.mxu0 %v168_v0 }
  0x10   :  { %146 = vmatpush3.msra.mxu0 %v23_v8 }
  0x11   :  { %147 = vmatprep.subr.mxu0 %v168_v0 }
  0x12   :  { %148 = vmatpush3.msra.mxu0 %v22_v9 }
  0x13   :  { %149 = vmatprep.subr.mxu0 %v168_v0 }
  0x14   :  { %150 = vmatpush3.msra.mxu0 %v21_v10 }
  0x15   :  { %151 = vmatprep.subr.mxu0 %v168_v0 }
  0x16   :  { %152 = vmatpush3.msra.mxu0 %v20_v11 }
  0x17   :  { %153 = vmatprep.subr.mxu0 %v168_v0 }
  0x18   :  { %154 = vmatpush3.msra.mxu0 %v19_v12 }
  0x19   :  { %155 = vmatprep.subr.mxu0 %v168_v0 }
  0x1a   :  { %156 = vmatpush3.msra.mxu0 %v18_v13 }
  0x1b   :  { %157 = vmatprep.subr.mxu0 %v168_v0 }
  0x1c   :  { %158 = vmatpush3.msra.mxu0 %v17_v14 }
  0x1d   :  { %159 = vmatprep.subr.mxu0 %v168_v0 }
  0x1e   :  { %160 = vmatpush3.msra.mxu0 %v16_v15 }
  0x1f   :  { %161 = vmatprep.subr.mxu0 %v168_v0 }
  0x20   :  { %162 = vmatpush3.msra.mxu0 %v15_v16 }
  0x21   :  { %164 = vmatmul.mubr.f32.vlgmr.msra.gmra.mxu0 %v14_v17 }
  0xe1   :  { %v104_v19 = vpop.f32.mrf.mxu0 }
  0xe2   :  { %v105_v20 = vadd.f32 %v113_v18, %v104_v19 }
  0xe3   :  { %v165_v21 = vpop.f32.mrf.mxu0 }
  0xe4   :  { %108 = vst [vmem:[%s250_s3] sm:$0xff] %v105_v20 }

// kernel: rel_mha_forward.3
= control target key start
LH: loop header
LB: loop body
LE: loop exit
PB: predicated region body
PF: predicated region fallthrough
CT: control target
= control target key end

     0   :  { %8 = vsyncpa [#allocation3], 0  ;;  %s337_s12 = smov [#allocation2]   ;;  %s393_s0 = inlined_call_operand.vmem [shape: f32[16,128], index: 0, kind: input, shape index: {}]   ;;  %s394_s1 = inlined_call_operand.hbm [shape: f32[128,384], index: 1, kind: input, shape index: {}]   ;;  %s395_s2 = inlined_call_operand.vmem [shape: f32[1,384], index: 2, kind: input, shape index: {}]   ;;  %s396_s3 = inlined_call_operand.vmem [shape: f32[16,384], index: 3, kind: output, shape index: {}]  }
   0x1   :  { %s16_s13 = sshll.u32 %s337_s12, 4  ;;  %s17_s13 = int_to_ptr.vmem [resolvable:$true] %s16_s13 }
   0x2   :  { %s323_s14 = scalar_lea.vmem %s17_s13, 6144  ;;  %p328_p1 = scmp.lt.s32.totalorder %s17_s13, %s17_s13 }
   0x3   :  { %p324_p0 = scmp.ne.s32.totalorder %s17_s13, %s323_s14  ;;  %p329_p2 = scmp.lt.s32.totalorder %s323_s14, %s323_s14 }
   0x5   :  { %p330_p3 = por %p329_p2, %p328_p1 }
   0x7   :  { %p331_p4 = pnand %p330_p3, %p324_p0 }
   0x9   :  { %334 = shalt.err (!%p331_p4)
}
   0xa   :  { %s338_s15 = smov 384   ;;  %s339_s16 = smov 24  }
   0xb   :  { %22 = dma.hbm_to_vmem [thread:$0]  %s394_s1, 6144, %s17_s13, [#allocation3], %s338_s15, %s338_s15, %s339_s16  }
   0xc   :  { %335 = dma.done.wait [#allocation3], 6144  }
   0xd   :  { %336 = vsyncadd [#allocation3], 4294961152  ;;  %v340_v0 = vmov 0.0   ;;  %v76_v1 = vld [vmem:[#allocation2 + $0x170] sm:$0xff]  ;;  %v75_v2 = vld [vmem:[#allocation2 + $0x168] sm:$0xff]  ;;  %v80_v51 = vlaneseq }
   0xe   :  { %159 = vmatprep.mubr.f32.mxu0 %v340_v0  ;;  %v73_v3 = vld [vmem:[#allocation2 + $0x158] sm:$0xff]  ;;  %95 = vmatprep.subr.mxu0 %v76_v1  ;;  %v72_v5 = vld [vmem:[#allocation2 + $0x150] sm:$0xff]  ;;  %v70_v6 = vld [vmem:[#allocation2 + $0x140] sm:$0xff] }
   0xf   :  { %v77_v4 = vld [vmem:[#allocation2 + $0x178] sm:$0xff]  ;;  %96 = vmatpush1.msra.mxu0 %v75_v2  ;;  %v74_v7 = vld [vmem:[#allocation2 + $0x160] sm:$0xff]  ;;  %v71_v9 = vld [vmem:[#allocation2 + $0x148] sm:$0xff]  ;;  %v81_v52 = vshrl.u32 %v80_v51, 7 }
  0x10   :  { %276 = vmatprep.subr.mxu1 %v77_v4  ;;  %97 = vmatprep.subr.mxu0 %v73_v3  ;;  %v69_v8 = vld [vmem:[#allocation2 + $0x138] sm:$0xff]  ;;  %v67_v10 = vld [vmem:[#allocation2 + $0x128] sm:$0xff]  ;;  %v66_v11 = vld [vmem:[#allocation2 + $0x120] sm:$0xff] }
  0x11   :  { %277 = vmatpush3.msra.mxu1 %v77_v4  ;;  %98 = vmatpush1.msra.mxu0 %v72_v5  ;;  %v68_v12 = vld [vmem:[#allocation2 + $0x130] sm:$0xff]  ;;  %v63_v14 = vld [vmem:[#allocation2 + $0x108] sm:$0xff]  ;;  %v65_v15 = vld [vmem:[#allocation2 + $0x118] sm:$0xff]  ;;  %v82_v53 = vsub.s32 0, %v81_v52  ;;  %v86_v55 = vsub.s32 1, %v81_v52  ;;  %v90_v56 = vsub.s32 2, %v81_v52 }
  0x12   :  { %278 = vmatprep.subr.mxu1 %v74_v7  ;;  %99 = vmatprep.subr.mxu0 %v70_v6  ;;  %v64_v13 = vld [vmem:[#allocation2 + $0x110] sm:$0xff]  ;;  %v61_v16 = vld [vmem:[#allocation2 + $0xf8] sm:$0xff]  ;;  %v62_v18 = vld [vmem:[#allocation2 + $0x100] sm:$0xff] }
  0x13   :  { %279 = vmatpush3.msra.mxu1 %v74_v7  ;;  %100 = vmatpush1.msra.mxu0 %v69_v8  ;;  %v60_v17 = vld [vmem:[#allocation2 + $0xf0] sm:$0xff]  ;;  %v58_v19 = vld [vmem:[#allocation2 + $0xe0] sm:$0xff]  ;;  %v57_v20 = vld [vmem:[#allocation2 + $0xd8] sm:$0xff] }
  0x14   :  { %280 = vmatprep.subr.mxu1 %v71_v9  ;;  %101 = vmatprep.subr.mxu0 %v67_v10  ;;  %v59_v21 = vld [vmem:[#allocation2 + $0xe8] sm:$0xff]  ;;  %v54_v23 = vld [vmem:[#allocation2 + $0xc0] sm:$0xff]  ;;  %v56_v24 = vld [vmem:[#allocation2 + $0xd0] sm:$0xff] }
  0x15   :  { %281 = vmatpush3.msra.mxu1 %v71_v9  ;;  %102 = vmatpush1.msra.mxu0 %v66_v11  ;;  %v55_v22 = vld [vmem:[#allocation2 + $0xc8] sm:$0xff]  ;;  %v52_v25 = vld [vmem:[#allocation2 + $0xb0] sm:$0xff]  ;;  %v53_v27 = vld [vmem:[#allocation2 + $0xb8] sm:$0xff] }
  0x16   :  { %282 = vmatprep.subr.mxu1 %v68_v12  ;;  %103 = vmatprep.subr.mxu0 %v64_v13  ;;  %v51_v26 = vld [vmem:[#allocation2 + $0xa8] sm:$0xff]  ;;  %v49_v28 = vld [vmem:[#allocation2 + $0x98] sm:$0xff]  ;;  %v48_v29 = vld [vmem:[#allocation2 + $0x90] sm:$0xff] }
  0x17   :  { %283 = vmatpush3.msra.mxu1 %v68_v12  ;;  %104 = vmatpush1.msra.mxu0 %v63_v14  ;;  %v50_v30 = vld [vmem:[#allocation2 + $0xa0] sm:$0xff]  ;;  %v45_v32 = vld [vmem:[#allocation2 + $0x78] sm:$0xff]  ;;  %v47_v33 = vld [vmem:[#allocation2 + $0x88] sm:$0xff] }
  0x18   :  { %284 = vmatprep.subr.mxu1 %v65_v15  ;;  %105 = vmatprep.subr.mxu0 %v61_v16  ;;  %v46_v31 = vld [vmem:[#allocation2 + $0x80] sm:$0xff]  ;;  %v43_v34 = vld [vmem:[#allocation2 + $0x68] sm:$0xff]  ;;  %v44_v36 = vld [vmem:[#allocation2 + $0x70] sm:$0xff] }
  0x19   :  { %285 = vmatpush3.msra.mxu1 %v65_v15  ;;  %106 = vmatpush1.msra.mxu0 %v60_v17  ;;  %v42_v35 = vld [vmem:[#allocation2 + $0x60] sm:$0xff]  ;;  %v40_v37 = vld [vmem:[#allocation2 + $0x50] sm:$0xff]  ;;  %v39_v38 = vld [vmem:[#allocation2 + $0x48] sm:$0xff] }
  0x1a   :  { %286 = vmatprep.subr.mxu1 %v62_v18  ;;  %107 = vmatprep.subr.mxu0 %v58_v19  ;;  %v41_v39 = vld [vmem:[#allocation2 + $0x58] sm:$0xff]  ;;  %v36_v41 = vld [vmem:[#allocation2 + $0x30] sm:$0xff]  ;;  %v38_v42 = vld [vmem:[#allocation2 + $0x40] sm:$0xff] }
  0x1b   :  { %287 = vmatpush3.msra.mxu1 %v62_v18  ;;  %108 = vmatpush1.msra.mxu0 %v57_v20  ;;  %v37_v40 = vld [vmem:[#allocation2 + $0x38] sm:$0xff]  ;;  %v34_v43 = vld [vmem:[#allocation2 + $0x20] sm:$0xff]  ;;  %v35_v45 = vld [vmem:[#allocation2 + $0x28] sm:$0xff] }
  0x1c   :  { %288 = vmatprep.subr.mxu1 %v59_v21  ;;  %109 = vmatprep.subr.mxu0 %v55_v22  ;;  %v33_v44 = vld [vmem:[#allocation2 + $0x18] sm:$0xff]  ;;  %v31_v46 = vld [vmem:[#allocation2 + $0x8] sm:$0xff]  ;;  %v30_v47 = vld [vmem:[#allocation2] sm:$0xff] }
  0x1d   :  { %289 = vmatpush3.msra.mxu1 %v59_v21  ;;  %110 = vmatpush1.msra.mxu0 %v54_v23  ;;  %v32_v48 = vld [vmem:[#allocation2 + $0x10] sm:$0xff]  ;;  %v28_v49 = vld [vmem:[%s393_s0] sm:$0xff]  ;;  %v29_v50 = vld [vmem:[%s393_s0 + $0x8] sm:$0xff] }
  0x1e   :  { %290 = vmatprep.subr.mxu1 %v56_v24  ;;  %111 = vmatprep.subr.mxu0 %v52_v25  ;;  %v78_v54 = vld [vmem:[%s395_s2] sm:$0x7] }
  0x1f   :  { %291 = vmatpush3.msra.mxu1 %v56_v24  ;;  %112 = vmatpush1.msra.mxu0 %v51_v26  ;;  %v83_v57 = vrot.slane %v78_v54, %v82_v53  ;;  %v87_v58 = vrot.slane %v78_v54, %v86_v55  ;;  %v91_v59 = vrot.slane %v78_v54, %v90_v56 }
  0x20   :  { %292 = vmatprep.subr.mxu1 %v53_v27  ;;  %113 = vmatprep.subr.mxu0 %v49_v28 }
  0x21   :  { %293 = vmatpush3.msra.mxu1 %v53_v27  ;;  %114 = vmatpush1.msra.mxu0 %v48_v29 }
  0x22   :  { %294 = vmatprep.subr.mxu1 %v50_v30  ;;  %115 = vmatprep.subr.mxu0 %v46_v31 }
  0x23   :  { %295 = vmatpush3.msra.mxu1 %v50_v30  ;;  %116 = vmatpush1.msra.mxu0 %v45_v32 }
  0x24   :  { %296 = vmatprep.subr.mxu1 %v47_v33  ;;  %117 = vmatprep.subr.mxu0 %v43_v34 }
  0x25   :  { %297 = vmatpush3.msra.mxu1 %v47_v33  ;;  %118 = vmatpush1.msra.mxu0 %v42_v35 }
  0x26   :  { %298 = vmatprep.subr.mxu1 %v44_v36  ;;  %119 = vmatprep.subr.mxu0 %v40_v37 }
  0x27   :  { %299 = vmatpush3.msra.mxu1 %v44_v36  ;;  %120 = vmatpush1.msra.mxu0 %v39_v38 }
  0x28   :  { %300 = vmatprep.subr.mxu1 %v41_v39  ;;  %121 = vmatprep.subr.mxu0 %v37_v40 }
  0x29   :  { %301 = vmatpush3.msra.mxu1 %v41_v39  ;;  %122 = vmatpush1.msra.mxu0 %v36_v41 }
  0x2a   :  { %302 = vmatprep.subr.mxu1 %v38_v42  ;;  %123 = vmatprep.subr.mxu0 %v34_v43 }
  0x2b   :  { %303 = vmatpush3.msra.mxu1 %v38_v42  ;;  %124 = vmatpush1.msra.mxu0 %v33_v44 }
  0x2c   :  { %304 = vmatprep.subr.mxu1 %v35_v45  ;;  %125 = vmatprep.subr.mxu0 %v31_v46 }
  0x2d   :  { %305 = vmatpush3.msra.mxu1 %v35_v45  ;;  %126 = vmatpush1.msra.mxu0 %v30_v47 }
  0x2e   :  { %306 = vmatprep.subr.mxu1 %v32_v48  ;;  %160 = vmatmul.mubr.f32.vlgmr.msra.gmra.mxu0 %v28_v49 }
  0x2f   :  { %307 = vmatpush3.msra.mxu1 %v32_v48  ;;  %308 = vmatprep.mubr.f32.mxu1 %v28_v49 }
  0x30   :  { %165 = vmatprep.mubr.f32.mxu0 %v340_v0  ;;  %309 = vmatmul.mubr.f32.vlgmr.msra.gmra.mxu1 %v29_v50 }
  0x32   :  { %166 = vmatmul.mubr.f32.gmra.mxu0 %v29_v50 }
  0xee   :  { %v161_v60 = vpop.f32.mrf.mxu0 }
  0xef   :  { %v162_v61 = vadd.f32 %v161_v60, %v83_v57 }
  0xf0   :  { %v163_v62 = vpop.f32.mrf.mxu0  ;;  %v310_v63 = vpop.f32.mrf.mxu1 }
  0xf1   :  { %247 = vst [vmem:[%s396_s3] sm:$0xff] %v162_v61  ;;  %v164_v0 = vadd.f32 %v163_v62, %v87_v58  ;;  %v244_v1 = vadd.f32 %v310_v63, %v91_v59 }
  0xf2   :  { %v167_v2 = vpop.f32.mrf.mxu0  ;;  %v238_v3 = vpop.f32.mrf.mxu1 }
  0xf3   :  { %248 = vst [vmem:[%s396_s3 + $0x8] sm:$0xff] %v164_v0  ;;  %252 = vst [vmem:[%s396_s3 + $0x28] sm:$0xff] %v244_v1  ;;  %v168_v4 = vadd.f32 %v167_v2, %v83_v57  ;;  %v239_v5 = vadd.f32 %v238_v3, %v91_v59 }
  0xf4   :  { %v169_v6 = vpop.f32.mrf.mxu0 }
  0xf5   :  { %250 = vst [vmem:[%s396_s3 + $0x18] sm:$0xff] %v168_v4  ;;  %249 = vst [vmem:[%s396_s3 + $0x10] sm:$0xff] %v239_v5  ;;  %v170_v7 = vadd.f32 %v169_v6, %v87_v58 }
  0xf7   :  { %251 = vst [vmem:[%s396_s3 + $0x20] sm:$0xff] %v170_v7 }
  0xf8   :  { %257 = vsyncpa [#allocation3], 1 }

// kernel: rel_mha_forward.5
= control target key start
LH: loop header
LB: loop body
LE: loop exit
PB: predicated region body
PF: predicated region fallthrough
CT: control target
= control target key end

     0   :  { %s1967_s13 = smov 0   ;;  %s1969_s14 = smov 0   ;;  %s2359_s0 = inlined_call_operand.vmem [shape: f32[2,8,3,2,64], index: 0, kind: input, shape index: {}]   ;;  %s2360_s1 = inlined_call_operand.vmem [shape: f32[8,2,64], index: 1, kind: input, shape index: {}]   ;;  %s2361_s2 = inlined_call_operand.vmem [shape: f32[2,64], index: 2, kind: input, shape index: {}]   ;;  %s2362_s3 = inlined_call_operand.vmem [shape: f32[2,64], index: 3, kind: input, shape index: {}]   ;;  %s2363_s4 = inlined_call_operand.vmem [shape: s8[8,8], index: 4, kind: input, shape index: {}]   ;;  %s2364_s5 = inlined_call_operand.vmem [shape: f32[2,64,128], index: 5, kind: input, shape index: {}]   ;;  %s2365_s6 = inlined_call_operand.vmem [shape: f32[1,128], index: 6, kind: input, shape index: {}]   ;;  %s2366_s7 = inlined_call_operand.vmem [shape: f32[2,8,128], index: 7, kind: input, shape index: {}]   ;;  %s2367_s8 = inlined_call_operand.vmem [shape: f32[1,128], index: 8, kind: input, shape index: {}]   ;;  %s2368_s9 = inlined_call_operand.vmem [shape: f32[1,128], index: 9, kind: input, shape index: {}]   ;;  %s2369_s10 = inlined_call_operand.vmem [shape: f32[2,8,128], index: 10, kind: output, shape index: {}]  }
   0x1   :  { %s1971_s15 = smov 0  }
   0x2 LB: > { %s32_s16 = sadd.s32 1, %s1901_s14  ;;  %p1680_p0 = scmp.ge.s32.totalorder %s1905_s15, 1  ;;  %s1905_s15 = sphi %s1971_s15, %s20_s15   ;;  %s1901_s14 = sphi %s1969_s14, %s2373_s14   ;;  %s1897_s13 = sphi %s1967_s13, %s2372_s13  }
   0x3   : > { %p34_p1 = scmp.ge.s32.totalorder %s32_s16, 2  ;;  %p377_p2 = scmp.lt.s32.totalorder %s1905_s15, 3 }
   0x5   : > { %s2375_s16 = smov (%p34_p1, %s32_s16), 0  ;;  %p378_p3 = pnand %p1680_p0, %p377_p2 }
   0x6   : > { %p439_p4 = scmp.lt.s32.totalorder (!%p378_p3), %s1897_s13, 1  ;;  %s1909_s25 = smov (!%p378_p3), 121  }
   0x7   : > { %381 = sbr.rel (%p378_p3) target bundleno = 1987 (0x7c3), region = 60  ;;  %s1910_s28 = smov (!%p378_p3), 256  }
   0xc   : > { %v1907_v0 = vmov 0.0   ;;  %v510_v1 = vld [vmem:[%s2360_s1 + $0x2] sm:$0x1]  ;;  %v511_v2 = vld [vmem:[%s2360_s1 + $0x4] sm:$0x1]  ;;  %vm552_vm0 = vcmask 1041409  }
   0xd   : > { %1775 = vmatprep.subr.mxu0 %v1907_v0  ;;  %1780 = vmatprep.subr.mxu1 %v1907_v0  ;;  %v512_v3 = vld [vmem:[%s2360_s1 + $0x6] sm:$0x1]  ;;  %v513_v4 = vld [vmem:[%s2360_s1 + $0x8] sm:$0x1]  ;;  %v509_v5 = vld [vmem:[%s2360_s1] sm:$0x1] }
   0xe   : > { %v514_v6 = vld [vmem:[%s2360_s1 + $0xa] sm:$0x1]  ;;  %v515_v7 = vld [vmem:[%s2360_s1 + $0xc] sm:$0x1]  ;;  %vm555_vm1 = vcmask 1042434   ;;  %v580_v8 = vrot.slane %v510_v1, 7 }
   0xf   : > { %v582_v9 = vrot.slane %v511_v2, 6  ;;  %v516_v10 = vld [vmem:[%s2360_s1 + $0xe] sm:$0x1]  ;;  %vm558_vm2 = vcmask 1043459   ;;  %v584_v11 = vrot.slane %v512_v3, 5  ;;  %v586_v12 = vrot.slane %v513_v4, 4 }
  0x10   : > { %s2377_s13 = smov (!%p439_p4, %s1897_s13), 1  ;;  %vm561_vm3 = vcmask 1044484   ;;  %v581_v13 = vsel %vm552_vm0, %v580_v8, %v509_v5  ;;  %v588_v14 = vrot.slane %v514_v6, 3  ;;  %vm564_vm4 = vcmask 1045509   ;;  %v1701_v19 = vld [vmem:[%s2362_s3] ss:$0 sm:$0xff] }
  0x11   : > { %v583_v15 = vsel %vm555_vm1, %v582_v9, %v581_v13  ;;  %v590_v16 = vrot.slane %v515_v7, 2  ;;  %vm1908_vm5 = vmmov 0   ;;  %s1843_s17 = smul.u32 48, %s2377_s13  ;;  %vm567_vm6 = vcmask 1046534   ;;  %v1700_v5 = vld [vmem:[%s2361_s2] ss:$0 sm:$0xff] }
  0x12   : > { %1777 = vmatprep.mubr.msk.f32.mxu0 %vm1908_vm5, %v1907_v0  ;;  %1782 = vmatprep.mubr.msk.f32.mxu1 %vm1908_vm5, %v1907_v0  ;;  %v585_v17 = vsel %vm558_vm2, %v584_v11, %v583_v15  ;;  %v592_v18 = vrot.slane %v516_v10, 1  ;;  %vm570_vm7 = vcmask 1047559   ;;  %vm594_vm8 = vcmask 523264  }
  0x13   : > { %v587_v20 = vsel %vm561_vm3, %v586_v12, %v585_v17  ;;  %s2028_s22 = scalar_lea.vmem %s2359_s0, %s1843_s17  ;;  %vm673_vm9 = vcmask 7168   ;;  %vm675_vm10 = vcmask 990208   ;;  %vm803_vm13 = vcmask 64512  }
  0x14   : > { %v589_v21 = vsel %vm564_vm4, %v588_v14, %v587_v20  ;;  %v483_v22 = vld [vmem:[%s2028_s22] sm:$0x1]  ;;  %v484_v23 = vld [vmem:[%s2028_s22 + $0x6] sm:$0x1]  ;;  %v485_v24 = vld [vmem:[%s2028_s22 + $0xc] sm:$0x1] }
  0x15   : > { %v591_v25 = vsel %vm567_vm6, %v590_v16, %v589_v21  ;;  %v486_v26 = vld [vmem:[%s2028_s22 + $0x12] sm:$0x1]  ;;  %v487_v27 = vld [vmem:[%s2028_s22 + $0x18] sm:$0x1]  ;;  %v488_v28 = vld [vmem:[%s2028_s22 + $0x1e] sm:$0x1]  ;;  %v535_v29 = vadd.f32 %v1701_v19, %v483_v22  ;;  %v536_v30 = vadd.f32 %v1701_v19, %v484_v23  ;;  %v537_v31 = vadd.f32 %v1701_v19, %v485_v24 }
  0x16   : > { %v593_v32 = vsel %vm570_vm7, %v592_v18, %v591_v25  ;;  %v489_v33 = vld [vmem:[%s2028_s22 + $0x24] sm:$0x1]  ;;  %v490_v34 = vld [vmem:[%s2028_s22 + $0x2a] sm:$0x1]  ;;  %v538_v35 = vadd.f32 %v1701_v19, %v486_v26  ;;  %v539_v36 = vadd.f32 %v1701_v19, %v487_v27  ;;  %v540_v37 = vadd.f32 %v1701_v19, %v488_v28  ;;  %v1684_v54 = vld [vmem:[%s2028_s22 + $0x2] sm:$0x1] }
  0x17   : > { %1776 = vmatpush3.xpose.msk.msra.mxu0 %vm594_vm8, %v593_v32  ;;  %v541_v38 = vadd.f32 %v1701_v19, %v489_v33  ;;  %v542_v39 = vadd.f32 %v1701_v19, %v490_v34  ;;  %v551_v40 = vrot.slane %v536_v30, 7  ;;  %v554_v41 = vrot.slane %v537_v31, 6  ;;  %v1685_v55 = vld [vmem:[%s2028_s22 + $0x8] sm:$0x1]  ;;  %v1686_v56 = vld [vmem:[%s2028_s22 + $0xe] sm:$0x1] }
  0x18   : > { %v557_v42 = vrot.slane %v538_v35, 5  ;;  %v560_v43 = vrot.slane %v539_v36, 4  ;;  %1785 = vmatprep.subr.mxu0 %v1907_v0  ;;  %v563_v45 = vrot.slane %v540_v37, 3  ;;  %v1687_v57 = vld [vmem:[%s2028_s22 + $0x14] sm:$0x1]  ;;  %v710_v62 = vrot.slane %v1685_v55, 7 }
  0x19   : > { %v553_v44 = vsel %vm552_vm0, %v551_v40, %v535_v29  ;;  %v566_v47 = vrot.slane %v541_v38, 2  ;;  %v569_v49 = vrot.slane %v542_v39, 1  ;;  %v1688_v58 = vld [vmem:[%s2028_s22 + $0x1a] sm:$0x1]  ;;  %v1689_v59 = vld [vmem:[%s2028_s22 + $0x20] sm:$0x1]  ;;  %v522_v8 = vadd.f32 %v1700_v5, %v483_v22 }
  0x1a   : > { %v556_v46 = vsel %vm555_vm1, %v554_v41, %v553_v44  ;;  %v1690_v60 = vld [vmem:[%s2028_s22 + $0x26] sm:$0x1]  ;;  %v1691_v61 = vld [vmem:[%s2028_s22 + $0x2c] sm:$0x1]  ;;  %v712_v63 = vrot.slane %v1686_v56, 6  ;;  %v714_v1 = vrot.slane %v1687_v57, 5  ;;  %v711_v6 = vsel %vm552_vm0, %v710_v62, %v1684_v54 }
  0x1b   : > { %v559_v48 = vsel %vm558_vm2, %v557_v42, %v556_v46  ;;  %v716_v2 = vrot.slane %v1688_v58, 4  ;;  %v718_v3 = vrot.slane %v1689_v59, 3  ;;  %v720_v4 = vrot.slane %v1690_v60, 2  ;;  %v943_v40 = vld [vmem:[%s2360_s1 + $0x1] sm:$0x1] }
  0x1c   : > { %v562_v50 = vsel %vm561_vm3, %v560_v43, %v559_v48  ;;  %v722_v7 = vrot.slane %v1691_v61, 1  ;;  %v523_v9 = vadd.f32 %v1700_v5, %v484_v23  ;;  %v713_v10 = vsel %vm555_vm1, %v712_v63, %v711_v6  ;;  %v944_v41 = vld [vmem:[%s2360_s1 + $0x3] sm:$0x1]  ;;  %v945_v42 = vld [vmem:[%s2360_s1 + $0x5] sm:$0x1] }
  0x1d   : > { %v565_v51 = vsel %vm564_vm4, %v563_v45, %v562_v50  ;;  %v524_v11 = vadd.f32 %v1700_v5, %v485_v24  ;;  %v525_v12 = vadd.f32 %v1700_v5, %v486_v26  ;;  %v526_v13 = vadd.f32 %v1700_v5, %v487_v27  ;;  %v946_v43 = vld [vmem:[%s2360_s1 + $0x7] sm:$0x1]  ;;  %v947_v44 = vld [vmem:[%s2360_s1 + $0x9] sm:$0x1]  ;;  %v948_v45 = vld [vmem:[%s2360_s1 + $0xb] sm:$0x1] }
  0x1e   : > { %v568_v52 = vsel %vm567_vm6, %v566_v47, %v565_v51  ;;  %v715_v14 = vsel %vm558_vm2, %v714_v1, %v713_v10  ;;  %v527_v15 = vadd.f32 %v1700_v5, %v488_v28  ;;  %v528_v16 = vadd.f32 %v1700_v5, %v489_v33  ;;  %v949_v46 = vld [vmem:[%s2360_s1 + $0xd] sm:$0x1]  ;;  %v950_v47 = vld [vmem:[%s2360_s1 + $0xf] sm:$0x1]  ;;  %v2112_v56 = vld [vmem:[%s2028_s22 + $0x1] sm:$0x1] }
  0x1f   : > { %v571_v53 = vsel %vm570_vm7, %v569_v49, %v568_v52  ;;  %v529_v17 = vadd.f32 %v1700_v5, %v490_v34  ;;  %v717_v18 = vsel %vm561_vm3, %v716_v2, %v715_v14  ;;  %v688_v19 = vrot.slane %v523_v9, 7  ;;  %v2117_v60 = vld [vmem:[%s2028_s22 + $0x7] sm:$0x1]  ;;  %v2120_v61 = vld [vmem:[%s2028_s22 + $0xd] sm:$0x1] }
  0x20   : > { %1778 = vmatmul.mubr.msk.f32.vlgmr.msra.gmra.mxu0 %vm594_vm8, %v571_v53  ;;  %v690_v20 = vrot.slane %v524_v11, 6  ;;  %v692_v21 = vrot.slane %v525_v12, 5  ;;  %v719_v25 = vsel %vm564_vm4, %v718_v3, %v717_v18  ;;  %v694_v29 = vrot.slane %v526_v13, 4  ;;  %v2125_v1 = vld [vmem:[%s2028_s22 + $0x13] sm:$0x1] }
  0x21   : > { %1787 = vmatprep.mubr.msk.f32.mxu0 %vm1908_vm5, %v1907_v0  ;;  %v721_v22 = vsel %vm567_vm6, %v720_v4, %v719_v25  ;;  %v689_v23 = vsel %vm552_vm0, %v688_v19, %v522_v8  ;;  %v696_v24 = vrot.slane %v527_v15, 3  ;;  %v698_v28 = vrot.slane %v528_v16, 2  ;;  %v2128_v2 = vld [vmem:[%s2028_s22 + $0x19] sm:$0x1]  ;;  %v2131_v3 = vld [vmem:[%s2028_s22 + $0x1f] sm:$0x1] }
  0x22   : > { %v723_v26 = vsel %vm570_vm7, %v722_v7, %v721_v22  ;;  %v691_v27 = vsel %vm555_vm1, %v690_v20, %v689_v23  ;;  %v700_v31 = vrot.slane %v529_v17, 1  ;;  %v1007_v48 = vrot.slane %v944_v41, 7  ;;  %v2136_v5 = vld [vmem:[%s2028_s22 + $0x25] sm:$0x1]  ;;  %v2139_v6 = vld [vmem:[%s2028_s22 + $0x2b] sm:$0x1] }
  0x23   : > { %1781 = vmatpush3.xpose.msk.msra.mxu1 %vm594_vm8, %v723_v26  ;;  %v693_v30 = vsel %vm558_vm2, %v692_v21, %v691_v27  ;;  %v1009_v49 = vrot.slane %v945_v42, 6  ;;  %v1011_v50 = vrot.slane %v946_v43, 5  ;;  %v1013_v51 = vrot.slane %v947_v44, 4  ;;  %v1724_v7 = vld [vmem:[%s2362_s3 + $0x1] ss:$0 sm:$0xff] }
  0x24   : > { %v695_v32 = vsel %vm561_vm3, %v694_v29, %v693_v30  ;;  %1790 = vmatprep.subr.mxu1 %v1907_v0  ;;  %v1008_v53 = vsel %vm552_vm0, %v1007_v48, %v943_v40  ;;  %v1015_v54 = vrot.slane %v948_v45, 3  ;;  %v1017_v55 = vrot.slane %v949_v46, 2  ;;  %v1719_v40 = vld [vmem:[%s2028_s22 + $0x1d] sm:$0x1] }
  0x25   : > { %v697_v33 = vsel %vm564_vm4, %v696_v24, %v695_v32  ;;  %v1010_v58 = vsel %vm555_vm1, %v1009_v49, %v1008_v53  ;;  %v1019_v59 = vrot.slane %v950_v47, 1  ;;  %v969_v9 = vadd.f32 %v1724_v7, %v2112_v56  ;;  %v1695_v53 = vld [vmem:[%s2028_s22 + $0x16] sm:$0x1] }
  0x26   : > { %v699_v34 = vsel %vm567_vm6, %v698_v28, %v697_v33  ;;  %v1012_v63 = vsel %vm558_vm2, %v1011_v50, %v1010_v58  ;;  %v970_v10 = vadd.f32 %v1724_v7, %v2117_v60  ;;  %v971_v11 = vadd.f32 %v1724_v7, %v2120_v61  ;;  %v481_v33 = vld [vmem:[%s2363_s4] sm:$0x3]  ;;  %v1692_v50 = vld [vmem:[%s2028_s22 + $0x4] sm:$0x1] }
  0x27   : > { %v701_v35 = vsel %vm570_vm7, %v700_v31, %v699_v34  ;;  %v1014_v4 = vsel %vm561_vm3, %v1013_v51, %v1012_v63  ;;  %v972_v13 = vadd.f32 %v1724_v7, %v2125_v1  ;;  %v973_v14 = vadd.f32 %v1724_v7, %v2128_v2  ;;  %v1693_v51 = vld [vmem:[%s2028_s22 + $0xa] sm:$0x1] }
  0x28   : > { %1783 = vmatmul.mubr.msk.f32.vlgmr.msra.gmra.mxu1 %vm594_vm8, %v701_v35  ;;  %v1016_v8 = vsel %vm564_vm4, %v1015_v54, %v1014_v4  ;;  %v974_v15 = vadd.f32 %v1724_v7, %v2131_v3  ;;  %v975_v17 = vadd.f32 %v1724_v7, %v2136_v5  ;;  %v976_v18 = vadd.f32 %v1724_v7, %v2139_v6  ;;  %v1696_v54 = vld [vmem:[%s2028_s22 + $0x1c] sm:$0x1] }
  0x29   : > { %1792 = vmatprep.mubr.msk.f32.mxu1 %vm1908_vm5, %v1907_v0  ;;  %v1018_v12 = vsel %vm567_vm6, %v1017_v55, %v1016_v8  ;;  %v985_v19 = vrot.slane %v970_v10, 7  ;;  %v987_v20 = vrot.slane %v971_v11, 6  ;;  %v989_v21 = vrot.slane %v972_v13, 5  ;;  %v1697_v55 = vld [vmem:[%s2028_s22 + $0x22] sm:$0x1] }
  0x2a   : > { %v1020_v16 = vsel %vm570_vm7, %v1019_v59, %v1018_v12  ;;  %v991_v25 = vrot.slane %v973_v14, 4  ;;  %v993_v22 = vrot.slane %v974_v15, 3  ;;  %v995_v24 = vrot.slane %v975_v17, 2 }
  0x2b   : > { %1791 = vmatpush3.xpose.msk.msra.mxu1 %vm594_vm8, %v1020_v16  ;;  %v986_v29 = vsel %vm552_vm0, %v985_v19, %v969_v9  ;;  %v997_v27 = vrot.slane %v976_v18, 1  ;;  %vm482_vm11 = vnez %v481_v33  ;;  %v1911_v34 = vmov 0   ;;  %v1711_v33 = vld [vmem:[%s2028_s22 + $0x1b] sm:$0x1] }
  0x2c   : > { %1800 = vmatprep.subr.mxu1 %v1907_v0  ;;  %v988_v23 = vsel %vm555_vm1, %v987_v20, %v986_v29  ;;  %v799_v35 = vsel %vm482_vm11, 16843009, %v1911_v34  ;;  %v823_v58 = vrot.slane %v1693_v51, 7  ;;  %v827_v63 = vrot.slane %v1695_v53, 5  ;;  %v1723_v20 = vld [vmem:[%s2361_s2 + $0x1] ss:$0 sm:$0xff] }
  0x2d   : > { %v990_v26 = vsel %vm558_vm2, %v989_v21, %v988_v23  ;;  %v829_v4 = vrot.slane %v1696_v54, 4  ;;  %v831_v8 = vrot.slane %v1697_v55, 3  ;;  %v1708_v21 = vld [vmem:[%s2028_s22 + $0x9] sm:$0x1]  ;;  %v1709_v29 = vld [vmem:[%s2028_s22 + $0xf] sm:$0x1]  ;;  %v963_v54 = vadd.f32 %v1723_v20, %v2139_v6 }
  0x2e   : > { %v992_v28 = vsel %vm561_vm3, %v991_v25, %v990_v26  ;;  %v824_v7 = vsel %vm552_vm0, %v823_v58, %v1692_v50  ;;  %v957_v25 = vadd.f32 %v1723_v20, %v2117_v60  ;;  %v1707_v23 = vld [vmem:[%s2028_s22 + $0x3] sm:$0x1]  ;;  %v1710_v26 = vld [vmem:[%s2028_s22 + $0x15] sm:$0x1]  ;;  %v1714_v50 = vld [vmem:[%s2028_s22 + $0x2d] sm:$0x1] }
  0x2f   : > { %v994_v30 = vsel %vm564_vm4, %v993_v22, %v992_v28  ;;  %v1134_v22 = vrot.slane %v1708_v21, 7  ;;  %v956_v28 = vadd.f32 %v1723_v20, %v2112_v56  ;;  %v1138_v34 = vrot.slane %v1710_v26, 5  ;;  %v1716_v21 = vld [vmem:[%s2028_s22 + $0xb] sm:$0x1] }
  0x30   : > { %v996_v31 = vsel %vm567_vm6, %v995_v24, %v994_v30  ;;  %v958_v24 = vadd.f32 %v1723_v20, %v2120_v61  ;;  %v1112_v30 = vrot.slane %v957_v25, 7  ;;  %v960_v61 = vadd.f32 %v1723_v20, %v2128_v2  ;;  %v1717_v25 = vld [vmem:[%s2028_s22 + $0x11] sm:$0x1] }
  0x31   : > { %v998_v32 = vsel %vm570_vm7, %v997_v27, %v996_v31  ;;  %v1136_v27 = vrot.slane %v1709_v29, 6  ;;  %v1135_v31 = vsel %vm552_vm0, %v1134_v22, %v1707_v23  ;;  %v1140_v56 = vrot.slane %v1711_v33, 4  ;;  %v1718_v29 = vld [vmem:[%s2028_s22 + $0x17] sm:$0x1]  ;;  %v1720_v22 = vld [vmem:[%s2028_s22 + $0x23] sm:$0x1] }
  0x32   : > { %1793 = vmatmul.mubr.msk.f32.vlgmr.msra.gmra.mxu1 %vm594_vm8, %v998_v32  ;;  %v959_v32 = vadd.f32 %v1723_v20, %v2125_v1  ;;  %v961_v1 = vadd.f32 %v1723_v20, %v2131_v3  ;;  %v1146_v55 = vrot.slane %v1714_v50, 1  ;;  %v1721_v23 = vld [vmem:[%s2028_s22 + $0x29] sm:$0x1]  ;;  %v1245_v26 = vrot.slane %v1717_v25, 6  ;;  %v917_v50 = vld [vmem:[%s2364_s5 + $0x30] sm:$0xff] }
  0x33   : > { %1802 = vmatprep.mubr.msk.f32.mxu1 %vm1908_vm5, %v1907_v0 }
  0x34   : > { %v1120_v51 = vrot.slane %v961_v1, 3  ;;  %v1733_v1 = vld [vmem:[%s2364_s5 + $0x58] sm:$0xff] }
  0xe0   : > { %v665_v36 = vpop.f32.mrf.mxu0 }
  0xe1   : > { %670 = vrot.lane.b32.xlu0 %v665_v36, %s1909_s25  ;;  %v800_v36 = vunpack.c.0.s8 %v799_v35  ;;  %v1114_v35 = vrot.slane %v958_v24, 6  ;;  %v1243_v24 = vrot.slane %v1716_v21, 7 }
  0xe2   : > { %v1779_v37 = vpop.f32.mrf.mxu0 }
  0xe3   : > { %vm2171_vm12 = vcmp.ne.s32.totalorder %v800_v36, 0  ;;  %v1137_v36 = vsel %vm555_vm1, %v1136_v27, %v1135_v31  ;;  %v1722_v27 = vld [vmem:[%s2028_s22 + $0x2f] sm:$0x1] }
  0xe8   : > { %v2084_v38 = vpop.f32.mrf.mxu1 }
  0xea   : > { %v1784_v39 = vpop.f32.mrf.mxu1 }
  0xf2   : > { %v1091_v44 = vpop.f32.mrf.mxu1 }
 0x153   : > { %v671_v52 = vpop.permute.xlu0 %670 }
 0x154   : > { %v674_v57 = vsel %vm673_vm9, %v671_v52, 0.0 }
 0x155   : > { %v676_v62 = vsel %vm675_vm10, %v674_v57, %v671_v52  ;;  %v1694_v52 = vld [vmem:[%s2028_s22 + $0x10] sm:$0x1]  ;;  %v1698_v57 = vld [vmem:[%s2028_s22 + $0x28] sm:$0x1] }
 0x156   : > { %678 = vrot.lane.b32.xlu0 %v676_v62, %s1910_s28  ;;  %v825_v59 = vrot.slane %v1694_v52, 6  ;;  %v1699_v62 = vld [vmem:[%s2028_s22 + $0x2e] sm:$0x1]  ;;  %v833_v10 = vrot.slane %v1698_v57, 2 }
 0x157   : > { %v835_v12 = vrot.slane %v1699_v62, 1  ;;  %v1124_v62 = vrot.slane %v963_v54, 1  ;;  %v912_v54 = vld [vmem:[%s2364_s5 + $0x8] sm:$0xff] }
 0x158   : > { %v826_v9 = vsel %vm555_vm1, %v825_v59, %v824_v7 }
 0x159   : > { %v828_v11 = vsel %vm558_vm2, %v827_v63, %v826_v9 }
 0x15a   : > { %1096 = vrot.lane.b32.xlu0 %v1091_v44, %s1909_s25  ;;  %v830_v13 = vsel %vm561_vm3, %v829_v4, %v828_v11  ;;  %v1713_v44 = vld [vmem:[%s2028_s22 + $0x27] sm:$0x1] }
 0x15b   : > { %v832_v14 = vsel %vm564_vm4, %v831_v8, %v830_v13  ;;  %v1144_v2 = vrot.slane %v1713_v44, 2  ;;  %v1732_v44 = vld [vmem:[%s2364_s5 + $0x50] sm:$0xff] }
 0x15c   : > { %v834_v15 = vsel %vm567_vm6, %v833_v10, %v832_v14 }
 0x15d   : > { %v836_v16 = vsel %vm570_vm7, %v835_v12, %v834_v15 }
 0x15e   : > { %1786 = vmatpush3.msra.mxu0 %v836_v16 }
 0x15f   : > { %1795 = vmatprep.subr.mxu0 %v1907_v0 }
 0x1c8   : > { %v679_v37 = vpop.permute.xlu0 %678 }
 0x1c9   : > { %v795_v39 = vadd.f32 %v2084_v38, %v679_v37  ;;  %v1794_v38 = vpop.f32.mrf.mxu1  ;;  %v1113_v37 = vsel %vm552_vm0, %v1112_v30, %v956_v28  ;;  %v1247_v28 = vrot.slane %v1718_v29, 5  ;;  %v1249_v30 = vrot.slane %v1719_v40, 4 }
 0x1cb   : > { %v798_v41 = vmul.f32 0.125, %v795_v39  ;;  %v1712_v39 = vld [vmem:[%s2028_s22 + $0x21] sm:$0x1] }
 0x1cc   : > { %v1097_v17 = vpop.permute.xlu0 %1096  ;;  %v1142_v38 = vrot.slane %v1712_v39, 3 }
 0x1cd   : > { %v802_v42 = vsel %vm2171_vm12, -inf, %v798_v41  ;;  %v1099_v18 = vsel %vm673_vm9, %v1097_v17, 0.0  ;;  %v1116_v41 = vrot.slane %v959_v32, 5  ;;  %v1251_v32 = vrot.slane %v1720_v22, 3 }
 0x1ce   : > { %v804_v43 = vsel %vm803_vm13, %v802_v42, -inf  ;;  %v1100_v19 = vsel %vm675_vm10, %v1099_v18, %v1097_v17 }
 0x1cf   : > { %805 = vmax.xlane.f32.xlu1 %v804_v43  ;;  %v1115_v43 = vsel %vm555_vm1, %v1114_v35, %v1113_v37 }
 0x258   : > { %v806_v45 = vpop.xlane.xlu1 %805 }
 0x259   : > { %v807_v46 = vsub.f32 %v802_v42, %v806_v45  ;;  %v1139_v42 = vsel %vm558_vm2, %v1138_v34, %v1137_v36  ;;  %v1118_v45 = vrot.slane %v960_v61, 4  ;;  %v1253_v34 = vrot.slane %v1721_v23, 2 }
 0x25b   : > { %v808_v47 = vmul.f32 1.442695, %v807_v46  ;;  %v1141_v46 = vsel %vm561_vm3, %v1140_v56, %v1139_v42  ;;  %v1737_v56 = vld [vmem:[%s2364_s5 + $0x78] sm:$0xff]  ;;  %v1735_v42 = vld [vmem:[%s2364_s5 + $0x68] sm:$0xff] }
 0x25c   : > { %v1143_v52 = vsel %vm564_vm4, %v1142_v38, %v1141_v46  ;;  %v1731_v38 = vld [vmem:[%s2364_s5 + $0x48] sm:$0xff] }
 0x25d   : > { %1873 = vpow2.f32 %v808_v47  ;;  %v1117_v47 = vsel %vm558_vm2, %v1116_v41, %v1115_v43  ;;  %v1145_v57 = vsel %vm567_vm6, %v1144_v2, %v1143_v52  ;;  %v1736_v41 = vld [vmem:[%s2364_s5 + $0x70] sm:$0xff]  ;;  %v1734_v43 = vld [vmem:[%s2364_s5 + $0x60] sm:$0xff]  ;;  %v916_v2 = vld [vmem:[%s2364_s5 + $0x28] sm:$0xff] }
 0x25e   : > { %v1119_v53 = vsel %vm561_vm3, %v1118_v45, %v1117_v47  ;;  %v914_v52 = vld [vmem:[%s2364_s5 + $0x18] sm:$0xff] }
 0x25f   : > { %v1121_v58 = vsel %vm564_vm4, %v1120_v51, %v1119_v53  ;;  %v915_v51 = vld [vmem:[%s2364_s5 + $0x20] sm:$0xff]  ;;  %v913_v53 = vld [vmem:[%s2364_s5 + $0x10] sm:$0xff] }
 0x26a   : > { %v2179_v48 = vpop.eup %1873 }
 0x26b   : > { %v810_v49 = vsel %vm803_vm13, %v2179_v48, 0.0 }
 0x26c   : > { %811 = vadd.xlane.f32.xlu1 %v810_v49  ;;  %v962_v49 = vadd.f32 %v1723_v20, %v2136_v5  ;;  %v1147_v5 = vsel %vm570_vm7, %v1146_v55, %v1145_v57  ;;  %v1715_v20 = vld [vmem:[%s2028_s22 + $0x5] sm:$0x1]  ;;  %s1682_s22 = sshll.u32 %s2377_s13, 3 }
 0x26d   : > { %v1244_v31 = vsel %vm552_vm0, %v1243_v24, %v1715_v20  ;;  %v911_v55 = vld [vmem:[%s2364_s5] sm:$0xff]  ;;  %s469_s20 = scalar_lea.vmem %s2366_s7, %s1682_s22  ;;  %s473_s30 = scalar_lea.vmem %s2369_s10, %s1682_s22 }
 0x26e   : > { %v1122_v3 = vrot.slane %v962_v49, 2  ;;  %v1246_v33 = vsel %vm555_vm1, %v1245_v26, %v1244_v31  ;;  %v918_v49 = vld [vmem:[%s2364_s5 + $0x38] sm:$0xff] }
 0x26f   : > { %v1248_v35 = vsel %vm558_vm2, %v1247_v28, %v1246_v33 }
 0x270   : > { %v1123_v4 = vsel %vm567_vm6, %v1122_v3, %v1121_v58  ;;  %v1250_v36 = vsel %vm561_vm3, %v1249_v30, %v1248_v35  ;;  %v1730_v3 = vld [vmem:[%s2364_s5 + $0x40] sm:$0xff] }
 0x271   : > { %v1125_v6 = vsel %vm570_vm7, %v1124_v62, %v1123_v4  ;;  %v1252_v37 = vsel %vm564_vm4, %v1251_v32, %v1250_v36 }
 0x272   : > { %v1254_v61 = vsel %vm567_vm6, %v1253_v34, %v1252_v37 }
 0x27d   : > { %1102 = vrot.lane.b32.xlu1 %v1100_v19, %s1910_s28 }
 0x2f5   : > { %v812_v60 = vpop.xlane.xlu1 %811 }
 0x2f6   : > { %1875 = vrcp.f32 %v812_v60  ;;  %v1255_v60 = vrot.slane %v1722_v27, 1 }
 0x2f8   : > { %v1256_v39 = vsel %vm570_vm7, %v1255_v60, %v1254_v61 }
 0x2f9   : > { %v1103_v8 = vpop.permute.xlu1 %1102  ;;  %1801 = vmatpush3.msra.mxu1 %v1256_v39 }
 0x2fa   : > { %1824 = vmatprep.subr.mxu1 %v1907_v0 }
 0x303   : > { %v1876_v59 = vpop.eup %1875 }
 0x304   : > { %v814_v63 = vmul.f32 %v1876_v59, %v2179_v48 }
 0x306   : > { %1788 = vmatmul.mubr.msk.f32.vlgmr.msra.gmra.mxu0 %vm803_vm13, %v814_v63  ;;  %v1740_v63 = vld [vmem:[%s2365_s6] ss:$0 sm:$0xff] }
 0x307   : > { %1796 = vmatpush3.xpose.msk.msra.mxu0 %vm594_vm8, %v1147_v5  ;;  %1797 = vmatprep.mubr.msk.f32.mxu0 %vm1908_vm5, %v1907_v0 }
 0x308   : > { %1805 = vmatprep.subr.mxu0 %v1907_v0 }
 0x30a   : > { %1798 = vmatmul.mubr.msk.f32.vlgmr.msra.gmra.mxu0 %vm594_vm8, %v1125_v6  ;;  %v1501_v6 = vld [vmem:[%s469_s20] sm:$0xff] }
 0x30b   : > { %1821 = vmatprep.mubr.msk.f32.mxu0 %vm1908_vm5, %v1907_v0  ;;  %1806 = vmatpush3.msra.mxu0 %v1737_v56 }
 0x30c   : > { %1807 = vmatprep.subr.mxu0 %v1907_v0 }
 0x30d   : > { %1808 = vmatpush3.msra.mxu0 %v1736_v41 }
 0x30e   : > { %1809 = vmatprep.subr.mxu0 %v1907_v0 }
 0x30f   : > { %1810 = vmatpush3.msra.mxu0 %v1735_v42 }
 0x310   : > { %1811 = vmatprep.subr.mxu0 %v1907_v0 }
 0x311   : > { %1812 = vmatpush3.msra.mxu0 %v1734_v43 }
 0x312   : > { %1813 = vmatprep.subr.mxu0 %v1907_v0 }
 0x313   : > { %1814 = vmatpush3.msra.mxu0 %v1733_v1 }
 0x314   : > { %1815 = vmatprep.subr.mxu0 %v1907_v0 }
 0x315   : > { %1816 = vmatpush3.msra.mxu0 %v1732_v44 }
 0x316   : > { %1817 = vmatprep.subr.mxu0 %v1907_v0 }
 0x317   : > { %1818 = vmatpush3.msra.mxu0 %v1731_v38 }
 0x318   : > { %1819 = vmatprep.subr.mxu0 %v1907_v0 }
 0x319   : > { %1820 = vmatpush3.msra.mxu0 %v1730_v3 }
 0x3c6   : > { %v2244_v48 = vpop.f32.mrf.mxu0 }
 0x3c8   : > { %v1789_v7 = vpop.f32.mrf.mxu0 }
 0x3ca   : > { %v1218_v9 = vpop.f32.mrf.mxu0 }
 0x3cb   : > { %v1219_v10 = vadd.f32 %v1218_v9, %v1103_v8 }
 0x3cc   : > { %v1799_v11 = vpop.f32.mrf.mxu0 }
 0x3cd   : > { %v1222_v12 = vmul.f32 0.125, %v1219_v10 }
 0x3cf   : > { %v1223_v13 = vsel %vm2171_vm12, -inf, %v1222_v12 }
 0x3d0   : > { %v1224_v14 = vsel %vm803_vm13, %v1223_v13, -inf }
 0x3d1   : > { %1225 = vmax.xlane.f32.xlu0 %v1224_v14 }
 0x45a   : > { %v1226_v15 = vpop.xlane.xlu0 %1225 }
 0x45b   : > { %v1227_v16 = vsub.f32 %v1223_v13, %v1226_v15 }
 0x45d   : > { %v1228_v17 = vmul.f32 1.442695, %v1227_v16  ;;  %v1741_v16 = vld [vmem:[%s2367_s8] ss:$0 sm:$0xff] }
 0x45f   : > { %1877 = vpow2.f32 %v1228_v17 }
 0x46c   : > { %v1878_v18 = vpop.eup %1877 }
 0x46d   : > { %v1230_v19 = vsel %vm803_vm13, %v1878_v18, 0.0 }
 0x46e   : > { %1231 = vadd.xlane.f32.xlu1 %v1230_v19 }
 0x4f7   : > { %v1232_v45 = vpop.xlane.xlu1 %1231 }
 0x4f8   : > { %1879 = vrcp.f32 %v1232_v45 }
 0x505   : > { %v1880_v46 = vpop.eup %1879 }
 0x506   : > { %v1234_v47 = vmul.f32 %v1880_v46, %v1878_v18  ;;  %v1742_v18 = vld [vmem:[%s2368_s9] ss:$0 sm:$0xff] }
 0x508   : > { %1803 = vmatmul.mubr.msk.f32.vlgmr.msra.gmra.mxu1 %vm803_vm13, %v1234_v47 }
 0x509   : > { %1825 = vmatpush3.msra.mxu1 %v918_v49  ;;  %1840 = vmatprep.mubr.msk.f32.mxu1 %vm1908_vm5, %v1907_v0 }
 0x50a   : > { %1826 = vmatprep.subr.mxu1 %v1907_v0 }
 0x50b   : > { %1827 = vmatpush3.msra.mxu1 %v917_v50 }
 0x50c   : > { %1828 = vmatprep.subr.mxu1 %v1907_v0 }
 0x50d   : > { %1829 = vmatpush3.msra.mxu1 %v916_v2 }
 0x50e   : > { %1830 = vmatprep.subr.mxu1 %v1907_v0 }
 0x50f   : > { %1831 = vmatpush3.msra.mxu1 %v915_v51 }
 0x510   : > { %1832 = vmatprep.subr.mxu1 %v1907_v0 }
 0x511   : > { %1833 = vmatpush3.msra.mxu1 %v914_v52 }
 0x512   : > { %1834 = vmatprep.subr.mxu1 %v1907_v0 }
 0x513   : > { %1835 = vmatpush3.msra.mxu1 %v913_v53 }
 0x514   : > { %1836 = vmatprep.subr.mxu1 %v1907_v0 }
 0x515   : > { %1837 = vmatpush3.msra.mxu1 %v912_v54 }
 0x516   : > { %1838 = vmatprep.subr.mxu1 %v1907_v0 }
 0x517   : > { %1839 = vmatpush3.msra.mxu1 %v911_v55 }
 0x518   : > { %1841 = vmatmul.mubr.msk.f32.vlgmr.msra.gmra.mxu1 %vm594_vm8, %v2244_v48 }
 0x5c8   : > { %v1327_v57 = vpop.f32.mrf.mxu1 }
 0x5c9   : > { %1822 = vmatmul.mubr.msk.f32.vlgmr.msra.gmra.mxu0 %vm594_vm8, %v1327_v57 }
 0x5ca   : > { %v1804_v58 = vpop.f32.mrf.mxu1 }
 0x5d8   : > { %v1482_v59 = vpop.f32.mrf.mxu1 }
 0x5da   : > { %v1842_v62 = vpop.f32.mrf.mxu1 }
 0x689   : > { %v1409_v0 = vpop.f32.mrf.mxu0 }
 0x68a   : > { %v1483_v5 = vadd.f32 %v1482_v59, %v1409_v0 }
 0x68b   : > { %v1823_v4 = vpop.f32.mrf.mxu0 }
 0x68c   : > { %v1500_v48 = vadd.f32 %v1740_v63, %v1483_v5 }
 0x68e   : > { %v1502_v7 = vadd.f32 %v1501_v6, %v1500_v48 }
 0x690   : > { %1503 = vadd.xlane.f32.xlu0 %v1502_v7 }
 0x719   : > { %v1504_v8 = vpop.xlane.xlu0 %1503 }
 0x71a   : > { %v1506_v9 = vmul.f32 0.0078125, %v1504_v8 }
 0x71c   : > { %v1507_v10 = vsub.f32 %v1502_v7, %v1506_v9 }
 0x71e   : > { %v1508_v11 = vmul.f32 %v1507_v10, %v1507_v10 }
 0x720   : > { %1509 = vadd.xlane.f32.xlu0 %v1508_v11 }
 0x7a9   : > { %v1510_v12 = vpop.xlane.xlu0 %1509 }
 0x7aa   : > { %v1511_v13 = vmul.f32 0.0078125, %v1510_v12 }
 0x7ac   : > { %v1512_v14 = vadd.f32 1e-05, %v1511_v13 }
 0x7ae   : > { %1881 = vrsqrt.f32 %v1512_v14 }
 0x7bb   : > { %v1882_v15 = vpop.eup %1881 }
 0x7bc   : > { %v1514_v17 = vmul.f32 %v1882_v15, %v1507_v10 }
 0x7be   : > { %v1522_v19 = vmul.f32 %v1741_v16, %v1514_v17 }
 0x7c0   : > { %v1530_v20 = vadd.f32 %v1742_v18, %v1522_v19 }
 0x7c2   : > { %1531 = vst [vmem:[%s473_s30] sm:$0xff] %v1530_v20 }
 0x7c3 PF: > { %s20_s15 = sadd.s32 1, %s1905_s15   ;;  %s2372_s13 = smov %s1901_s14 }
 0x7c4   : > { %p17_p5 = scmp.ge.s32.totalorder %s20_s15, 4   ;;  %s2373_s14 = smov %s2375_s16 }
 0x7c6   :  { %19 = sbr.rel (!%p17_p5) target bundleno = 2 (0x2), region = 116 }

</bundles_post_ra>
